<compile_context>
chip_gen: v5e
topology: v5e:2x2
jax: 0.10.0
libtpu: 0.0.40
codegen_flags: <defaults>
</compile_context>

<pallas_src>
import jax
import jax.numpy as jnp
from jax import lax
from jax.experimental import pallas as pl
from jax.experimental.pallas import tpu as pltpu


# ----------------------------------------------------------------------------
# Fused self-attention kernel: one batch element per grid step.
# ----------------------------------------------------------------------------
def _self_attention_kernel(x_ref, wqkv_ref, bqkv_ref, o_ref):
    # x_ref   : (1, C, L)   one batch element, channels-major, L = D*H*W
    # wqkv_ref: (3C, C)     stacked [Wq; Wk; Wv], layout (Cout, Cin)
    # bqkv_ref: (3C, 1)     stacked biases
    # o_ref   : (1, L, C)   row-major (L, C); wrapper reshapes to (C, D, H, W)
    C = x_ref.shape[1]
    x = x_ref[0]                                              # (C, L) f32

    # Fused 1x1x1-conv projections: one (3C, C) @ (C, L) MXU matmul.
    qkv = jnp.dot(wqkv_ref[...], x,
                  preferred_element_type=jnp.float32) + bqkv_ref[...]
    q = qkv[0 * C:1 * C]                                      # (C, L)
    k = qkv[1 * C:2 * C]                                      # (C, L)
    v = qkv[2 * C:3 * C]                                      # (C, L)

    # Channel-attention logits, contracting over L (wide MXU contraction):
    #   a[i, j] = sum_l q[i, l] * k[j, l]
    a = lax.dot_general(q, k, (((1,), (1,)), ((), ())),
                        preferred_element_type=jnp.float32)   # (C, C)

    # Row softmax of the C x C attention matrix (one reciprocal per row).
    a = a - jnp.max(a, axis=-1, keepdims=True)
    e = jnp.exp(a)
    inv = 1.0 / jnp.sum(e, axis=-1, keepdims=True)            # (C, 1)
    p = e * inv                                               # (C, C)

    # out[l, j] = sum_c v[c, l] * p[j, c]  ==  (p @ v)^T
    o = jnp.dot(p, v, preferred_element_type=jnp.float32)     # (C, L)
    o_ref[0] = jnp.transpose(o).astype(o_ref.dtype)           # (L, C)


def self_attention_pallas(params, x):
    """x: (N, C, D, H, W) float32 -> (N, C, D, H, W); matches the PyTorch module."""
    N, C, D, H, W = x.shape
    L = D * H * W
    x2 = x.reshape(N, C, L).astype(jnp.float32)               # free reshape

    # Stack the three 1x1x1-conv weights/biases once (tiny, outside the kernel).
    wqkv = jnp.concatenate(
        [params["wq"], params["wk"], params["wv"]], axis=0
    ).astype(jnp.float32)                                     # (3C, C)
    bqkv = jnp.concatenate(
        [params["bq"], params["bk"], params["bv"]], axis=0
    ).reshape(3 * C, 1).astype(jnp.float32)                   # (3C, 1)

    out = pl.pallas_call(
        _self_attention_kernel,
        out_shape=jax.ShapeDtypeStruct((N, L, C), jnp.float32),
        grid=(N,),
        in_specs=[
            pl.BlockSpec((1, C, L), lambda n: (n, 0, 0)),     # x (per-batch)
            pl.BlockSpec((3 * C, C), lambda n: (0, 0)),       # Wqkv (resident)
            pl.BlockSpec((3 * C, 1), lambda n: (0, 0)),       # bqkv (resident)
        ],
        out_specs=pl.BlockSpec((1, L, C), lambda n: (n, 0, 0)),
        compiler_params=pltpu.CompilerParams(
            dimension_semantics=("parallel",)),
    )(x2, wqkv, bqkv)

    # PyTorch does `.view(N, C, D, H, W)` on the contiguous (N, L, C) bmm
    # result, i.e. a flat row-major reinterpretation; reshape reproduces it.
    return out.reshape(N, C, D, H, W)


# ----------------------------------------------------------------------------
# Pure-JAX reference (direct transcription of the PyTorch forward)
# ----------------------------------------------------------------------------
def self_attention_ref(params, x):
    N, C, D, H, W = x.shape
    L = D * H * W
    x2 = x.reshape(N, C, L)

    def proj(w, b):
        return jnp.einsum("oc,ncl->nol", w, x2) + b[None, :, None]

    q = proj(params["wq"], params["bq"])                      # (N, C, L)
    k = proj(params["wk"], params["bk"])
    v = proj(params["wv"], params["bv"])

    key_t = jnp.transpose(k, (0, 2, 1))                       # (N, L, C)
    attn = jnp.einsum("ncl,nlo->nco", q, key_t)               # (N, C, C)
    attn = attn - jnp.max(attn, axis=-1, keepdims=True)
    attn = jnp.exp(attn)
    attn = attn / jnp.sum(attn, axis=-1, keepdims=True)

    value_t = jnp.transpose(v, (0, 2, 1))                     # (N, L, C)
    attn_t = jnp.transpose(attn, (0, 2, 1))                   # (N, C, C)
    out = jnp.einsum("nlc,nco->nlo", value_t, attn_t)         # (N, L, C)
    return out.reshape(N, C, D, H, W)


if __name__ == "__main__":
    # Small config: nf=128 channels (lane-dense), volume 4x8x8 -> L=256.
    N, nf, D, H, W = 2, 128, 4, 8, 8

    key = jax.random.PRNGKey(0)
    kx, kwq, kbq, kwk, kbk, kwv, kbv = jax.random.split(key, 7)
    scale = 1.0 / jnp.sqrt(nf)
    params = {
        "wq": jax.random.normal(kwq, (nf, nf), jnp.float32) * scale,
        "bq": jax.random.normal(kbq, (nf,), jnp.float32) * 0.01,
        "wk": jax.random.normal(kwk, (nf, nf), jnp.float32) * scale,
        "bk": jax.random.normal(kbk, (nf,), jnp.float32) * 0.01,
        "wv": jax.random.normal(kwv, (nf, nf), jnp.float32) * scale,
        "bv": jax.random.normal(kbv, (nf,), jnp.float32) * 0.01,
    }
    x = jax.random.normal(kx, (N, nf, D, H, W), jnp.float32)

    out = self_attention_pallas(params, x)
    out = jax.block_until_ready(out)

    ref = self_attention_ref(params, x)
    ref = jax.block_until_ready(ref)

    assert out.shape == (N, nf, D, H, W), out.shape
    max_err = float(jnp.max(jnp.abs(out - ref)))
    assert jnp.allclose(out, ref, atol=1e-3, rtol=1e-3), max_err

    print("KERNEL_OK")
</pallas_src>

<mosaic_0001>
module attributes {stable_mosaic.version = 11 : i64} {
  func.func @_self_attention_kernel(%arg0: i32, %arg1: memref<1x128x256xf32, #tpu.memory_space<vmem>>, %arg2: memref<384x128xf32, #tpu.memory_space<vmem>>, %arg3: memref<384x1xf32, #tpu.memory_space<vmem>>, %arg4: memref<1x256x128xf32, #tpu.memory_space<vmem>>) attributes {dimension_semantics = [#tpu.dimension_semantics<parallel>], iteration_bounds = array<i64: 2>, scalar_prefetch = 0 : i64, scratch_operands = 0 : i64, tpu.core_type = #tpu.core_type<tc>, window_params = [{transform_indices = @transform_0, window_bounds = array<i64: 1, 128, 256>}, {pipeline_mode = #tpu.pipeline_mode<synchronous>, transform_indices = @transform_1, window_bounds = array<i64: 384, 128>}, {pipeline_mode = #tpu.pipeline_mode<synchronous>, transform_indices = @transform_2, window_bounds = array<i64: 384, 1>}, {transform_indices = @transform_3, window_bounds = array<i64: 1, 256, 128>}]} {
    %c0 = arith.constant 0 : index
    %c0_0 = arith.constant 0 : index
    %c0_1 = arith.constant 0 : index
    %0 = vector.load %arg1[%c0, %c0_0, %c0_1] : memref<1x128x256xf32, #tpu.memory_space<vmem>>, vector<1x128x256xf32>
    %1 = vector.shape_cast %0 : vector<1x128x256xf32> to vector<128x256xf32>
    %c0_2 = arith.constant 0 : index
    %c0_3 = arith.constant 0 : index
    %2 = vector.load %arg2[%c0_2, %c0_3] : memref<384x128xf32, #tpu.memory_space<vmem>>, vector<384x128xf32>
    %cst = arith.constant dense<0.000000e+00> : vector<384x256xf32>
    %3 = tpu.matmul %2, %1, %cst {dimension_numbers = #tpu.dot_dimension_numbers<[1], [0], [0], [1], [0, 0, 1, 1], [], []>} : vector<384x128xf32>, vector<128x256xf32>, vector<384x256xf32> -> vector<384x256xf32>
    %c0_4 = arith.constant 0 : index
    %c0_5 = arith.constant 0 : index
    %4 = vector.load %arg3[%c0_4, %c0_5] : memref<384x1xf32, #tpu.memory_space<vmem>>, vector<384x1xf32>
    %5 = vector.broadcast %4 : vector<384x1xf32> to vector<384x256xf32>
    %6 = arith.addf %3, %5 : vector<384x256xf32>
    %7 = vector.extract_strided_slice %6 {offsets = [0, 0], sizes = [128, 256], strides = [1, 1]} : vector<384x256xf32> to vector<128x256xf32>
    %8 = vector.extract_strided_slice %6 {offsets = [128, 0], sizes = [128, 256], strides = [1, 1]} : vector<384x256xf32> to vector<128x256xf32>
    %9 = vector.extract_strided_slice %6 {offsets = [256, 0], sizes = [128, 256], strides = [1, 1]} : vector<384x256xf32> to vector<128x256xf32>
    %cst_6 = arith.constant dense<0.000000e+00> : vector<128x128xf32>
    %10 = tpu.matmul %7, %8, %cst_6 {dimension_numbers = #tpu.dot_dimension_numbers<[1], [1], [0], [0], [0, 0, 1, 0], [], []>} : vector<128x256xf32>, vector<128x256xf32>, vector<128x128xf32> -> vector<128x128xf32>
    %cst_7 = arith.constant dense<0xFF800000> : vector<128xf32>
    %11 = vector.multi_reduction <maximumf>, %10, %cst_7 [1] : vector<128x128xf32> to vector<128xf32>
    %12 = vector.shape_cast %11 : vector<128xf32> to vector<128x1xf32>
    %13 = vector.broadcast %12 : vector<128x1xf32> to vector<128x128xf32>
    %14 = arith.subf %10, %13 : vector<128x128xf32>
    %15 = math.exp %14 : vector<128x128xf32>
    %cst_8 = arith.constant dense<0.000000e+00> : vector<128xf32>
    %16 = vector.multi_reduction <add>, %15, %cst_8 [1] : vector<128x128xf32> to vector<128xf32>
    %17 = vector.shape_cast %16 : vector<128xf32> to vector<128x1xf32>
    %cst_9 = arith.constant 1.000000e+00 : f32
    %18 = vector.broadcast %cst_9 : f32 to vector<128x1xf32>
    %19 = arith.divf %18, %17 : vector<128x1xf32>
    %20 = vector.broadcast %19 : vector<128x1xf32> to vector<128x128xf32>
    %21 = arith.mulf %15, %20 : vector<128x128xf32>
    %cst_10 = arith.constant dense<0.000000e+00> : vector<128x256xf32>
    %22 = tpu.matmul %21, %9, %cst_10 {dimension_numbers = #tpu.dot_dimension_numbers<[1], [0], [0], [1], [0, 0, 1, 1], [], []>} : vector<128x128xf32>, vector<128x256xf32>, vector<128x256xf32> -> vector<128x256xf32>
    %23 = tpu.transpose %22, [1, 0] : vector<128x256xf32> -> vector<256x128xf32>
    %c0_11 = arith.constant 0 : index
    %c0_12 = arith.constant 0 : index
    %c0_13 = arith.constant 0 : index
    %24 = vector.load %arg4[%c0_11, %c0_12, %c0_13] : memref<1x256x128xf32, #tpu.memory_space<vmem>>, vector<1x256x128xf32>
    %25 = vector.shape_cast %24 : vector<1x256x128xf32> to vector<256x128xf32>
    %26 = vector.shape_cast %23 : vector<256x128xf32> to vector<1x256x128xf32>
    tpu.vector_store %arg4[%c0_11, %c0_12, %c0_13], %26 {strides = array<i32>} : memref<1x256x128xf32, #tpu.memory_space<vmem>>, vector<1x256x128xf32>,
    return
  }
  func.func @transform_0(%arg0: i32) -> (i32, i32, i32) {
    %c0_i32 = arith.constant 0 : i32
    %c0_i32_0 = arith.constant 0 : i32
    %c0_i32_1 = arith.constant 0 : i32
    return %arg0, %c0_i32, %c0_i32_0 : i32, i32, i32
  }
  func.func @transform_1(%arg0: i32) -> (i32, i32) {
    %c0_i32 = arith.constant 0 : i32
    %c0_i32_0 = arith.constant 0 : i32
    %c0_i32_1 = arith.constant 0 : i32
    return %c0_i32, %c0_i32_0 : i32, i32
  }
  func.func @transform_2(%arg0: i32) -> (i32, i32) {
    %c0_i32 = arith.constant 0 : i32
    %c0_i32_0 = arith.constant 0 : i32
    %c0_i32_1 = arith.constant 0 : i32
    return %c0_i32, %c0_i32_0 : i32, i32
  }
  func.func @transform_3(%arg0: i32) -> (i32, i32, i32) {
    %c0_i32 = arith.constant 0 : i32
    %c0_i32_0 = arith.constant 0 : i32
    %c0_i32_1 = arith.constant 0 : i32
    return %arg0, %c0_i32, %c0_i32_0 : i32, i32, i32
  }
}

</mosaic_0001>

<bundles_post_ra>
// kernel: tpu_custom_call.1
= control target key start
LH: loop header
LB: loop body
LE: loop exit
PB: predicated region body
PF: predicated region fallthrough
CT: control target
= control target key end

     0   :  { %8 = vsyncpa [#allocation3], 0  ;;  %s2838_s0 = inlined_call_operand.hbm [shape: f32[2,128,256], index: 0, kind: input, shape index: {}]   ;;  %s2839_s1 = inlined_call_operand.vmem [shape: f32[384,128], index: 1, kind: input, shape index: {}]   ;;  %s2840_s2 = inlined_call_operand.vmem [shape: f32[384,1], index: 2, kind: input, shape index: {}]   ;;  %s2841_s3 = inlined_call_operand.hbm [shape: f32[2,256,128], index: 3, kind: output, shape index: {}]  }
   0x1   :  { %10 = vsyncpa [#allocation3 + $0x1], 0 }
   0x2   :  { %11 = vsyncpa [#allocation4], 0 }
   0x3   :  { %13 = vsyncpa [#allocation4 + $0x1], 0  ;;  %s1951_s12 = smov 0   ;;  %s1953_s13 = smov 0  }
   0x4   :  { %s1955_s14 = smov 0   ;;  %s1957_s15 = smov 0  }
   0x5 LB: > { %s1972_s16 = sadd.s32 4294967295, %s1924_s15   ;;  %s1694_s17 = sadd.s32 4294967294, %s1924_s15   ;;  %s1924_s15 = sphi %s1957_s15, %s2879_s15   ;;  %s1920_s14 = sphi %s1955_s14, %s2878_s14   ;;  %s1916_s13 = sphi %s1953_s13, %s2877_s13   ;;  %s1912_s12 = sphi %s1951_s12, %s2876_s12  }
   0x6   : > { %s1976_s18 = sadd.s32 1, %s1924_s15   ;;  %s26_s19 = sadd.s32 1, %s1920_s14 }
   0x7   : > { %s23_s20 = ssub.s32 %s1924_s15, %s1976_s18  ;;  %p33_p0 = scmp.ne.s32.totalorder %s1920_s14, %s1916_s13 }
   0x8   : > { %p24_p1 = scmp.eq.s32.totalorder %s23_s20, 0  ;;  %p34_p2 = scmp.eq.s32.totalorder %s1924_s15, 0 }
   0x9   : > { %p39_p3 = scmp.ne.s32.totalorder %s1916_s13, %s1912_s12  ;;  %p40_p4 = scmp.eq.s32.totalorder %s1972_s16, 0 }
   0xa   : > { %s1988_s21 = scalar_select %p24_p1, %s1920_s14, %s26_s19  }
   0xb   : > { %p1990_p5 = por %p34_p2, %p33_p0  ;;  %p1994_p6 = por %p40_p4, %p39_p3 }
   0xc   : > { %p105_p7 = scmp.eq.s32.totalorder %s1972_s16, 1  ;;  %p111_p8 = scmp.eq.s32.totalorder %s1694_s17, 1 }
   0xd   : > { %p1722_p10 = scmp.lt.s32.totalorder %s1924_s15, 2  ;;  %s137_s26 = sand.u32 1, %s1920_s14  }
   0xe   : > { %p2001_p11 = por %p105_p7, %p33_p0  ;;  %p2005_p12 = por %p111_p8, %p39_p3 }
   0xf   : > { %s1708_s27 = sshll.u32 %s1924_s15, 8  ;;  %s1697_s28 = sshll.u32 %s137_s26, 8 }
  0x10   : > { %s146_s4 = scalar_lea.hbm %s2838_s0, %s1708_s27  ;;  %s141_s6 = scalar_lea.vmem [#allocation2], %s1697_s28 }
  0x11   : > { %s147_s5 = sshll.u32 %s146_s4, 4  ;;  %s149_s7 = sshll.u32 %s141_s6, 4  ;;  %s148_s5 = int_to_ptr.hbm [resolvable:$true] %s147_s5  ;;  %s150_s7 = int_to_ptr.vmem [resolvable:$true] %s149_s7 }
  0x12   : > { %p2016_p13 = pnand %p1722_p10, %p1990_p5  ;;  %p1700_p0 = scmp.ge.s32.totalorder %s1924_s15, 1 }
  0x13   : > { %p157_p1 = scmp.lt.s32.totalorder %s1924_s15, 3  ;;  %s138_s9 = scalar_lea.sflag [#allocation3], %s137_s26 }
  0x14   : > { %s1828_s10 = sshra.s32 %s148_s5, 4  ;;  %p1832_p3 = pneg %p2016_p13  ;;  %s1829_s10 = int_to_ptr.hbm [resolvable:$true] %s1828_s10 }
  0x15   : > { %s1830_s11 = scalar_lea.hbm %s1829_s10, 256  ;;  %s1835_s20 = scalar_lea.hbm %s2838_s0, 512 }
  0x16   : > { %p1831_p2 = scmp.ne.s32.totalorder %s1829_s10, %s1830_s11  ;;  %p1836_p5 = scmp.lt.s32.totalorder %s1829_s10, %s2838_s0 }
  0x17   : > { %p1837_p8 = scmp.lt.s32.totalorder %s1835_s20, %s1830_s11 }
  0x18   : > { %p1833_p4 = pnand %p1832_p3, %p1831_p2 }
  0x19   : > { %p1838_p10 = por %p1837_p8, %p1836_p5 }
  0x1a   : > { %p1834_p7 = pneg %p1833_p4 }
  0x1c   : > { %p1839_p9 = pnand %p1838_p10, %p1834_p7 }
  0x1e   : > { %1842 = shalt.err (!%p1839_p9)
}
  0x1f   : > { %s1926_s26 = smov 256   ;;  %s1927_s28 = smov 16  }
  0x20   : > { %1717 = dma.hbm_to_vmem [thread:$0]  (!%p2016_p13), %s148_s5, 4096, %s150_s7, %s138_s9, %s1926_s26, %s1926_s26, %s1927_s28  }
  0x21   : > { %p158_p2 = pnand %p1700_p0, %p157_p1 }
  0x23   : > { %161 = sbr.rel (%p158_p2) target bundleno = 1463 (0x5b7), region = 32 }
  0x28   : > { %s2037_s29 = sand.u32 1, %s1916_s13  }
  0x29   : > { %s1701_s30 = sshll.u32 %s2037_s29, 8  ;;  %s164_s4 = scalar_lea.sflag [#allocation3], %s2037_s29 }
  0x2a   : > { %s2043_s6 = scalar_lea.vmem [#allocation2], %s1701_s30 }
  0x2b   : > { %1903 = dma.done.wait (%p1994_p6), %s164_s4, 4096  }
  0x2c   : > { %1905 = vsyncadd (%p1994_p6), %s164_s4, 4294963200  ;;  %v1928_v0 = vmov 0   ;;  %v221_v1 = vld [vmem:[%s2043_s6 + $0xf0] sm:$0xff]  ;;  %v222_v2 = vld [vmem:[%s2043_s6 + $0xf8] sm:$0xff]  ;;  %s2770_s7 = scalar_lea.vmem [#allocation5], %s1701_s30  ;;  %s1709_s30 = sshll.u32 %s1972_s16, 8 }
  0x2d   : > { %1762 = vset.pattern.permute.xlu1 %v1928_v0  ;;  %1761 = vset.pattern.permute.xlu0 %v1928_v0  ;;  %v300_v3 = vld [vmem:[%s2840_s2 + $0xe8] sm:$0xff]  ;;  %v219_v4 = vld [vmem:[%s2043_s6 + $0xe0] sm:$0xff]  ;;  %v217_v6 = vld [vmem:[%s2043_s6 + $0xd0] sm:$0xff]  ;;  %s1617_s9 = scalar_lea.hbm %s2841_s3, %s1709_s30  ;;  %s1618_s10 = sshll.u32 %s2770_s7, 4  ;;  %s1619_s10 = int_to_ptr.vmem [resolvable:$true] %s1618_s10 }
  0x2e   : > { %1763 = vset.pattern.permute.xlu2 %v1928_v0  ;;  %559 = vmatpush.msra.mxu0 %v221_v1  ;;  %v220_v5 = vld [vmem:[%s2043_s6 + $0xe8] sm:$0xff]  ;;  %v218_v7 = vld [vmem:[%s2043_s6 + $0xd8] sm:$0xff]  ;;  %v215_v9 = vld [vmem:[%s2043_s6 + $0xc0] sm:$0xff]  ;;  %s1620_s11 = sshll.u32 %s1617_s9, 4  ;;  %s1606_s17 = scalar_lea.sflag [#allocation4], %s2037_s29  ;;  %s1621_s11 = int_to_ptr.hbm [resolvable:$true] %s1620_s11 }
  0x2f   : > { %720 = vmatpush.msra.mxu1 %v222_v2  ;;  %466 = vperm.xlu1 %1762, %v300_v3   ;;  %v302_v8 = vld [vmem:[%s2840_s2 + $0xf8] sm:$0xff]  ;;  %v216_v10 = vld [vmem:[%s2043_s6 + $0xc8] sm:$0xff]  ;;  %v213_v11 = vld [vmem:[%s2043_s6 + $0xb0] sm:$0xff]  ;;  %s1872_s19 = sshra.s32 %s1621_s11, 4  ;;  %s1878_s27 = scalar_lea.hbm %s2841_s3, 512  ;;  %s1873_s19 = int_to_ptr.hbm [resolvable:$true] %s1872_s19 }
  0x30   : > { %560 = vmatpush.msra.mxu0 %v219_v4  ;;  %476 = vperm.xlu0 %1761, %v302_v8   ;;  %v214_v12 = vld [vmem:[%s2043_s6 + $0xb8] sm:$0xff]  ;;  %v299_v13 = vld [vmem:[%s2840_s2 + $0xe0] sm:$0xff]  ;;  %v212_v15 = vld [vmem:[%s2043_s6 + $0xa8] sm:$0xff]  ;;  %s1874_s16 = scalar_lea.hbm %s1873_s19, 256  ;;  %p1879_p0 = scmp.lt.s32.totalorder %s1873_s19, %s2841_s3 }
  0x31   : > { %721 = vmatpush.msra.mxu1 %v220_v5  ;;  %v211_v14 = vld [vmem:[%s2043_s6 + $0xa0] sm:$0xff]  ;;  %v301_v16 = vld [vmem:[%s2840_s2 + $0xf0] sm:$0xff]  ;;  %v210_v18 = vld [vmem:[%s2043_s6 + $0x98] sm:$0xff]  ;;  %p1875_p6 = scmp.ne.s32.totalorder %s1873_s19, %s1874_s16  ;;  %p1880_p1 = scmp.lt.s32.totalorder %s1878_s27, %s1874_s16 }
  0x32   : > { %561 = vmatpush.msra.mxu0 %v217_v6  ;;  %v209_v17 = vld [vmem:[%s2043_s6 + $0x90] sm:$0xff]  ;;  %v207_v19 = vld [vmem:[%s2043_s6 + $0x80] sm:$0xff]  ;;  %v208_v20 = vld [vmem:[%s2043_s6 + $0x88] sm:$0xff] }
  0x33   : > { %722 = vmatpush.msra.mxu1 %v218_v7  ;;  %v298_v21 = vld [vmem:[%s2840_s2 + $0xd8] sm:$0xff]  ;;  %v205_v22 = vld [vmem:[%s2043_s6 + $0x70] sm:$0xff]  ;;  %v295_v24 = vld [vmem:[%s2840_s2 + $0xc0] sm:$0xff]  ;;  %p1876_p9 = pnand %p1875_p6, %p2001_p11  ;;  %p1881_p3 = por %p1880_p1, %p1879_p0 }
  0x34   : > { %562 = vmatpush.msra.mxu0 %v215_v9  ;;  %v206_v23 = vld [vmem:[%s2043_s6 + $0x78] sm:$0xff]  ;;  %456 = vperm.xlu2 %1763, %v298_v21   ;;  %v203_v25 = vld [vmem:[%s2043_s6 + $0x60] sm:$0xff]  ;;  %v204_v26 = vld [vmem:[%s2043_s6 + $0x68] sm:$0xff] }
  0x35   : > { %723 = vmatpush.msra.mxu1 %v216_v10  ;;  %v296_v27 = vld [vmem:[%s2840_s2 + $0xc8] sm:$0xff]  ;;  %v201_v28 = vld [vmem:[%s2043_s6 + $0x50] sm:$0xff]  ;;  %v202_v29 = vld [vmem:[%s2043_s6 + $0x58] sm:$0xff]  ;;  %p1877_p13 = pneg %p1876_p9 }
  0x36   : > { %563 = vmatpush.msra.mxu0 %v213_v11  ;;  %v297_v30 = vld [vmem:[%s2840_s2 + $0xd0] sm:$0xff]  ;;  %v199_v31 = vld [vmem:[%s2043_s6 + $0x40] sm:$0xff]  ;;  %v200_v32 = vld [vmem:[%s2043_s6 + $0x48] sm:$0xff] }
  0x37   : > { %724 = vmatpush.msra.mxu1 %v214_v12  ;;  %461 = vperm.xlu1 %1762, %v299_v13   ;;  %v197_v33 = vld [vmem:[%s2043_s6 + $0x30] sm:$0xff]  ;;  %v198_v34 = vld [vmem:[%s2043_s6 + $0x38] sm:$0xff]  ;;  %v292_v35 = vld [vmem:[%s2840_s2 + $0xa8] sm:$0xff]  ;;  %p1882_p4 = pnand %p1881_p3, %p1877_p13 }
  0x38   : > { %564 = vmatpush.msra.mxu0 %v211_v14  ;;  %471 = vperm.xlu0 %1761, %v301_v16   ;;  %v195_v36 = vld [vmem:[%s2043_s6 + $0x20] sm:$0xff]  ;;  %v196_v37 = vld [vmem:[%s2043_s6 + $0x28] sm:$0xff]  ;;  %v293_v38 = vld [vmem:[%s2840_s2 + $0xb0] sm:$0xff] }
  0x39   : > { %725 = vmatpush.msra.mxu1 %v212_v15  ;;  %v193_v39 = vld [vmem:[%s2043_s6 + $0x10] sm:$0xff]  ;;  %v194_v40 = vld [vmem:[%s2043_s6 + $0x18] sm:$0xff]  ;;  %v191_v42 = vld [vmem:[%s2043_s6] sm:$0xff] }
  0x3a   : > { %565 = vmatpush.msra.mxu0 %v209_v17  ;;  %v294_v41 = vld [vmem:[%s2840_s2 + $0xb8] sm:$0xff]  ;;  %v192_v43 = vld [vmem:[%s2043_s6 + $0x8] sm:$0xff]  ;;  %v223_v44 = vld [vmem:[%s2839_s1] sm:$0xff] }
  0x3b   : > { %726 = vmatpush.msra.mxu1 %v210_v18  ;;  %v289_v45 = vld [vmem:[%s2840_s2 + $0x90] sm:$0xff]  ;;  %v290_v46 = vld [vmem:[%s2840_s2 + $0x98] sm:$0xff]  ;;  %v291_v47 = vld [vmem:[%s2840_s2 + $0xa0] sm:$0xff] }
  0x3c   : > { %566 = vmatpush.msra.mxu0 %v207_v19  ;;  %451 = vperm.xlu2 %1763, %v297_v30   ;;  %v224_v48 = vld [vmem:[%s2839_s1 + $0x8] sm:$0xff]  ;;  %v271_v49 = vld [vmem:[%s2840_s2] sm:$0xff]  ;;  %v225_v52 = vld [vmem:[%s2839_s1 + $0x10] sm:$0xff] }
  0x3d   : > { %727 = vmatpush.msra.mxu1 %v208_v20  ;;  %v287_v50 = vld [vmem:[%s2840_s2 + $0x80] sm:$0xff]  ;;  %v288_v51 = vld [vmem:[%s2840_s2 + $0x88] sm:$0xff]  ;;  %v274_v53 = vld [vmem:[%s2840_s2 + $0x18] sm:$0xff] }
  0x3e   : > { %567 = vmatpush.msra.mxu0 %v205_v22  ;;  %v273_v54 = vld [vmem:[%s2840_s2 + $0x10] sm:$0xff]  ;;  %v272_v55 = vld [vmem:[%s2840_s2 + $0x8] sm:$0xff]  ;;  %v226_v56 = vld [vmem:[%s2839_s1 + $0x18] sm:$0xff] }
  0x3f   : > { %728 = vmatpush.msra.mxu1 %v206_v23  ;;  %441 = vperm.xlu1 %1762, %v295_v24   ;;  %v277_v57 = vld [vmem:[%s2840_s2 + $0x30] sm:$0xff]  ;;  %v276_v58 = vld [vmem:[%s2840_s2 + $0x28] sm:$0xff]  ;;  %v227_v59 = vld [vmem:[%s2839_s1 + $0x20] sm:$0xff] }
  0x40   : > { %568 = vmatpush.msra.mxu0 %v203_v25  ;;  %446 = vperm.xlu0 %1761, %v296_v27   ;;  %v275_v60 = vld [vmem:[%s2840_s2 + $0x20] sm:$0xff]  ;;  %v228_v61 = vld [vmem:[%s2839_s1 + $0x28] sm:$0xff]  ;;  %v229_v63 = vld [vmem:[%s2839_s1 + $0x30] sm:$0xff] }
  0x41   : > { %729 = vmatpush.msra.mxu1 %v204_v26  ;;  %v279_v62 = vld [vmem:[%s2840_s2 + $0x40] sm:$0xff]  ;;  %v280_v0 = vld [vmem:[%s2840_s2 + $0x48] sm:$0xff]  ;;  %v230_v1 = vld [vmem:[%s2839_s1 + $0x38] sm:$0xff] }
  0x42   : > { %569 = vmatpush.msra.mxu0 %v201_v28  ;;  %v278_v2 = vld [vmem:[%s2840_s2 + $0x38] sm:$0xff]  ;;  %v231_v3 = vld [vmem:[%s2839_s1 + $0x40] sm:$0xff]  ;;  %v232_v5 = vld [vmem:[%s2839_s1 + $0x48] sm:$0xff] }
  0x43   : > { %730 = vmatpush.msra.mxu1 %v202_v29  ;;  %v282_v4 = vld [vmem:[%s2840_s2 + $0x58] sm:$0xff]  ;;  %v283_v6 = vld [vmem:[%s2840_s2 + $0x60] sm:$0xff]  ;;  %v233_v7 = vld [vmem:[%s2839_s1 + $0x50] sm:$0xff] }
  0x44   : > { %570 = vmatpush.msra.mxu0 %v199_v31  ;;  %436 = vperm.xlu2 %1763, %v294_v41   ;;  %v281_v8 = vld [vmem:[%s2840_s2 + $0x50] sm:$0xff]  ;;  %v234_v9 = vld [vmem:[%s2839_s1 + $0x58] sm:$0xff]  ;;  %v235_v11 = vld [vmem:[%s2839_s1 + $0x60] sm:$0xff] }
  0x45   : > { %731 = vmatpush.msra.mxu1 %v200_v32  ;;  %v285_v10 = vld [vmem:[%s2840_s2 + $0x70] sm:$0xff]  ;;  %v286_v12 = vld [vmem:[%s2840_s2 + $0x78] sm:$0xff]  ;;  %v236_v13 = vld [vmem:[%s2839_s1 + $0x68] sm:$0xff] }
  0x46   : > { %571 = vmatpush.msra.mxu0 %v197_v33  ;;  %v284_v14 = vld [vmem:[%s2840_s2 + $0x68] sm:$0xff]  ;;  %v237_v15 = vld [vmem:[%s2839_s1 + $0x70] sm:$0xff]  ;;  %v238_v16 = vld [vmem:[%s2839_s1 + $0x78] sm:$0xff] }
  0x47   : > { %732 = vmatpush.msra.mxu1 %v198_v34  ;;  %426 = vperm.xlu1 %1762, %v292_v35   ;;  %v239_v19 = vld [vmem:[%s2839_s1 + $0x80] sm:$0xff]  ;;  %v240_v22 = vld [vmem:[%s2839_s1 + $0x88] sm:$0xff]  ;;  %v241_v25 = vld [vmem:[%s2839_s1 + $0x90] sm:$0xff] }
  0x48   : > { %572 = vmatpush.msra.mxu0 %v195_v36  ;;  %431 = vperm.xlu0 %1761, %v293_v38   ;;  %v242_v28 = vld [vmem:[%s2839_s1 + $0x98] sm:$0xff]  ;;  %v243_v31 = vld [vmem:[%s2839_s1 + $0xa0] sm:$0xff]  ;;  %v244_v34 = vld [vmem:[%s2839_s1 + $0xa8] sm:$0xff] }
  0x49   : > { %733 = vmatpush.msra.mxu1 %v196_v37  ;;  %v245_v37 = vld [vmem:[%s2839_s1 + $0xb0] sm:$0xff]  ;;  %v318_v38 = vld [vmem:[%s2840_s2 + $0x178] sm:$0xff] }
  0x4a   : > { %573 = vmatpush.msra.mxu0 %v193_v39  ;;  %v246_v41 = vld [vmem:[%s2839_s1 + $0xb8] sm:$0xff] }
  0x4b   : > { %734 = vmatpush.msra.mxu1 %v194_v40 }
  0x4c   : > { %574 = vmatpush.msra.mxu0 %v191_v42  ;;  %421 = vperm.xlu2 %1763, %v291_v47   ;;  %v315_v42 = vld [vmem:[%s2840_s2 + $0x160] sm:$0xff] }
  0x4d   : > { %735 = vmatpush.msra.mxu1 %v192_v43  ;;  %575 = vmatmul.f32.vlgmr.msra.gmra.mxu0 %v223_v44 }
  0x4e   : > { %736 = vmatmul.f32.vlgmr.msra.gmra.mxu1 %v223_v44 }
  0x4f   : > { %411 = vperm.xlu1 %1762, %v289_v45   ;;  %v247_v45 = vld [vmem:[%s2839_s1 + $0xc0] sm:$0xff] }
  0x50   : > { %416 = vperm.xlu0 %1761, %v290_v46   ;;  %v313_v46 = vld [vmem:[%s2840_s2 + $0x150] sm:$0xff] }
  0x54   : > { %406 = vperm.xlu2 %1763, %v288_v51  }
  0x55   : > { %578 = vmatmul.f32.gmra.mxu0 %v224_v48 }
  0x56   : > { %739 = vmatmul.f32.gmra.mxu1 %v224_v48 }
  0x57   : > { %321 = vperm.xlu1 %1762, %v271_v49   ;;  %v248_v49 = vld [vmem:[%s2839_s1 + $0xc8] sm:$0xff] }
  0x58   : > { %401 = vperm.xlu0 %1761, %v287_v50   ;;  %v312_v50 = vld [vmem:[%s2840_s2 + $0x148] sm:$0xff] }
  0x5c   : > { %326 = vperm.xlu2 %1763, %v272_v55   ;;  %v317_v55 = vld [vmem:[%s2840_s2 + $0x170] sm:$0xff] }
  0x5d   : > { %581 = vmatmul.f32.gmra.mxu0 %v225_v52 }
  0x5e   : > { %742 = vmatmul.f32.gmra.mxu1 %v225_v52 }
  0x5f   : > { %336 = vperm.xlu1 %1762, %v274_v53   ;;  %v249_v53 = vld [vmem:[%s2839_s1 + $0xd0] sm:$0xff] }
  0x60   : > { %331 = vperm.xlu0 %1761, %v273_v54   ;;  %v311_v54 = vld [vmem:[%s2840_s2 + $0x140] sm:$0xff] }
  0x64   : > { %341 = vperm.xlu2 %1763, %v275_v60   ;;  %v314_v60 = vld [vmem:[%s2840_s2 + $0x158] sm:$0xff] }
  0x65   : > { %584 = vmatmul.f32.gmra.mxu0 %v226_v56 }
  0x66   : > { %745 = vmatmul.f32.gmra.mxu1 %v226_v56 }
  0x67   : > { %351 = vperm.xlu1 %1762, %v277_v57  }
  0x68   : > { %346 = vperm.xlu0 %1761, %v276_v58   ;;  %v250_v58 = vld [vmem:[%s2839_s1 + $0xd8] sm:$0xff] }
  0x6c   : > { %356 = vperm.xlu2 %1763, %v278_v2  }
  0x6d   : > { %587 = vmatmul.f32.gmra.mxu0 %v227_v59 }
  0x6e   : > { %748 = vmatmul.f32.gmra.mxu1 %v227_v59  ;;  %v310_v59 = vld [vmem:[%s2840_s2 + $0x138] sm:$0xff] }
  0x6f   : > { %366 = vperm.xlu1 %1762, %v280_v0   ;;  %v309_v0 = vld [vmem:[%s2840_s2 + $0x130] sm:$0xff] }
  0x70   : > { %361 = vperm.xlu0 %1761, %v279_v62  }
  0x74   : > { %371 = vperm.xlu2 %1763, %v281_v8   ;;  %v253_v8 = vld [vmem:[%s2839_s1 + $0xf0] sm:$0xff] }
  0x75   : > { %590 = vmatmul.f32.gmra.mxu0 %v228_v61 }
  0x76   : > { %751 = vmatmul.f32.gmra.mxu1 %v228_v61 }
  0x77   : > { %381 = vperm.xlu1 %1762, %v283_v6  }
  0x78   : > { %376 = vperm.xlu0 %1761, %v282_v4   ;;  %v252_v4 = vld [vmem:[%s2839_s1 + $0xe8] sm:$0xff] }
  0x7c   : > { %386 = vperm.xlu2 %1763, %v284_v14   ;;  %v255_v14 = vld [vmem:[%s2839_s1 + $0x100] sm:$0xff] }
  0x7d   : > { %593 = vmatmul.f32.gmra.mxu0 %v229_v63 }
  0x7e   : > { %754 = vmatmul.f32.gmra.mxu1 %v229_v63  ;;  %v251_v63 = vld [vmem:[%s2839_s1 + $0xe0] sm:$0xff] }
  0x7f   : > { %396 = vperm.xlu1 %1762, %v286_v12  }
  0x80   : > { %391 = vperm.xlu0 %1761, %v285_v10  }
  0x85   : > { %596 = vmatmul.f32.gmra.mxu0 %v230_v1 }
  0x86   : > { %757 = vmatmul.f32.gmra.mxu1 %v230_v1  ;;  %v308_v1 = vld [vmem:[%s2840_s2 + $0x128] sm:$0xff] }
  0x87   : > { %551 = vperm.xlu1 %1762, %v317_v55  }
  0x88   : > { %556 = vperm.xlu0 %1761, %v318_v38  }
  0x8d   : > { %599 = vmatmul.f32.gmra.mxu0 %v231_v3 }
  0x8e   : > { %760 = vmatmul.f32.gmra.mxu1 %v231_v3 }
  0x8f   : > { %536 = vperm.xlu1 %1762, %v314_v60  }
  0x90   : > { %541 = vperm.xlu0 %1761, %v315_v42  }
  0x95   : > { %602 = vmatmul.f32.gmra.mxu0 %v232_v5 }
  0x96   : > { %763 = vmatmul.f32.gmra.mxu1 %v232_v5  ;;  %v306_v5 = vld [vmem:[%s2840_s2 + $0x118] sm:$0xff] }
  0x97   : > { %506 = vperm.xlu1 %1762, %v308_v1  }
  0x98   : > { %531 = vperm.xlu0 %1761, %v313_v46   ;;  %v259_v46 = vld [vmem:[%s2839_s1 + $0x120] sm:$0xff] }
  0x9d   : > { %605 = vmatmul.f32.gmra.mxu0 %v233_v7 }
  0x9e   : > { %766 = vmatmul.f32.gmra.mxu1 %v233_v7 }
  0x9f   : > { %496 = vperm.xlu1 %1762, %v306_v5  }
  0xa0   : > { %526 = vperm.xlu0 %1761, %v312_v50  }
  0xa5   : > { %608 = vmatmul.f32.gmra.mxu0 %v234_v9 }
  0xa6   : > { %769 = vmatmul.f32.gmra.mxu1 %v234_v9 }
  0xa8   : > { %521 = vperm.xlu0 %1761, %v311_v54  }
  0xad   : > { %611 = vmatmul.f32.gmra.mxu0 %v235_v11 }
  0xae   : > { %772 = vmatmul.f32.gmra.mxu1 %v235_v11  ;;  %v254_v11 = vld [vmem:[%s2839_s1 + $0xf8] sm:$0xff] }
  0xb0   : > { %516 = vperm.xlu0 %1761, %v310_v59  }
  0xb5   : > { %614 = vmatmul.f32.gmra.mxu0 %v236_v13 }
  0xb6   : > { %775 = vmatmul.f32.gmra.mxu1 %v236_v13 }
  0xb8   : > { %511 = vperm.xlu0 %1761, %v309_v0  }
  0xbd   : > { %617 = vmatmul.f32.gmra.mxu0 %v237_v15 }
  0xbe   : > { %778 = vmatmul.f32.gmra.mxu1 %v237_v15  ;;  %v316_v15 = vld [vmem:[%s2840_s2 + $0x168] sm:$0xff] }
  0xbf   : > { %546 = vperm.xlu2 %1763, %v316_v15  }
  0xc5   : > { %620 = vmatmul.f32.gmra.mxu0 %v238_v16 }
  0xc6   : > { %781 = vmatmul.f32.gmra.mxu1 %v238_v16 }
  0xca   : > { %v2225_v17 = vpop.f32.mrf.mxu0 }
  0xcb   : > { %v2227_v18 = vpop.f32.mrf.mxu1 }
  0xcd   : > { %623 = vmatmul.f32.gmra.mxu0 %v239_v19 }
  0xce   : > { %784 = vmatmul.f32.gmra.mxu1 %v239_v19 }
  0xd2   : > { %v2232_v20 = vpop.f32.mrf.mxu0 }
  0xd3   : > { %v2234_v21 = vpop.f32.mrf.mxu1 }
  0xd5   : > { %626 = vmatmul.f32.gmra.mxu0 %v240_v22 }
  0xd6   : > { %787 = vmatmul.f32.gmra.mxu1 %v240_v22  ;;  %v256_v22 = vld [vmem:[%s2839_s1 + $0x108] sm:$0xff] }
  0xda   : > { %v2239_v23 = vpop.f32.mrf.mxu0 }
  0xdb   : > { %v2241_v24 = vpop.f32.mrf.mxu1 }
  0xdd   : > { %629 = vmatmul.f32.gmra.mxu0 %v241_v25 }
  0xde   : > { %790 = vmatmul.f32.gmra.mxu1 %v241_v25  ;;  %v307_v25 = vld [vmem:[%s2840_s2 + $0x120] sm:$0xff] }
  0xdf   : > { %501 = vperm.xlu2 %1763, %v307_v25  }
  0xe2   : > { %v2246_v26 = vpop.f32.mrf.mxu0 }
  0xe3   : > { %v2248_v27 = vpop.f32.mrf.mxu1 }
  0xe5   : > { %632 = vmatmul.f32.gmra.mxu0 %v242_v28 }
  0xe6   : > { %793 = vmatmul.f32.gmra.mxu1 %v242_v28 }
  0xea   : > { %v2253_v29 = vpop.f32.mrf.mxu0 }
  0xeb   : > { %v2255_v30 = vpop.f32.mrf.mxu1 }
  0xed   : > { %635 = vmatmul.f32.gmra.mxu0 %v243_v31 }
  0xee   : > { %796 = vmatmul.f32.gmra.mxu1 %v243_v31 }
  0xf2   : > { %v2260_v32 = vpop.f32.mrf.mxu0 }
  0xf3   : > { %v2262_v33 = vpop.f32.mrf.mxu1 }
  0xf5   : > { %638 = vmatmul.f32.gmra.mxu0 %v244_v34 }
  0xf6   : > { %799 = vmatmul.f32.gmra.mxu1 %v244_v34  ;;  %v257_v34 = vld [vmem:[%s2839_s1 + $0x110] sm:$0xff] }
  0xfa   : > { %v2267_v35 = vpop.f32.mrf.mxu0 }
  0xfb   : > { %v2269_v36 = vpop.f32.mrf.mxu1 }
  0xfd   : > { %641 = vmatmul.f32.gmra.mxu0 %v245_v37 }
  0xfe   : > { %802 = vmatmul.f32.gmra.mxu1 %v245_v37 }
 0x102   : > { %v2277_v39 = vpop.f32.mrf.mxu0 }
 0x103   : > { %v2279_v40 = vpop.f32.mrf.mxu1 }
 0x105   : > { %644 = vmatmul.f32.gmra.mxu0 %v246_v41 }
 0x106   : > { %805 = vmatmul.f32.gmra.mxu1 %v246_v41  ;;  %v258_v41 = vld [vmem:[%s2839_s1 + $0x118] sm:$0xff] }
 0x10a   : > { %v2287_v43 = vpop.f32.mrf.mxu0 }
 0x10b   : > { %v2289_v44 = vpop.f32.mrf.mxu1 }
 0x10d   : > { %647 = vmatmul.f32.gmra.mxu0 %v247_v45 }
 0x10e   : > { %808 = vmatmul.f32.gmra.mxu1 %v247_v45 }
 0x112   : > { %v2297_v47 = vpop.f32.mrf.mxu0 }
 0x113   : > { %2847 = vst [vmem:[#allocation8_spill] sm:$0xff] %v2297_v47  ;;  %v2299_v48 = vpop.f32.mrf.mxu1  ;;  %v457_v47 = vpop.permute.xlu2 %456 }
 0x114   : > { %2848 = vst [vmem:[#allocation9_spill] sm:$0xff] %v2299_v48 }
 0x115   : > { %650 = vmatmul.f32.gmra.mxu0 %v248_v49 }
 0x116   : > { %811 = vmatmul.f32.gmra.mxu1 %v248_v49 }
 0x11a   : > { %v2307_v51 = vpop.f32.mrf.mxu0 }
 0x11b   : > { %2849 = vst [vmem:[#allocation10_spill] sm:$0xff] %v2307_v51  ;;  %v2309_v52 = vpop.f32.mrf.mxu1 }
 0x11c   : > { %2850 = vst [vmem:[#allocation11_spill] sm:$0xff] %v2309_v52 }
 0x11d   : > { %653 = vmatmul.f32.gmra.mxu0 %v249_v53 }
 0x11e   : > { %814 = vmatmul.f32.gmra.mxu1 %v249_v53  ;;  %v260_v53 = vld [vmem:[%s2839_s1 + $0x128] sm:$0xff] }
 0x122   : > { %v2320_v56 = vpop.f32.mrf.mxu0 }
 0x123   : > { %2851 = vst [vmem:[#allocation12_spill] sm:$0xff] %v2320_v56  ;;  %v2322_v57 = vpop.f32.mrf.mxu1 }
 0x124   : > { %2852 = vst [vmem:[#allocation13_spill] sm:$0xff] %v2322_v57 }
 0x125   : > { %656 = vmatmul.f32.gmra.mxu0 %v250_v58 }
 0x126   : > { %817 = vmatmul.f32.gmra.mxu1 %v250_v58  ;;  %v261_v58 = vld [vmem:[%s2839_s1 + $0x130] sm:$0xff] }
 0x12a   : > { %v2333_v61 = vpop.f32.mrf.mxu0 }
 0x12b   : > { %2853 = vst [vmem:[#allocation14_spill] sm:$0xff] %v2333_v61  ;;  %v2335_v62 = vpop.f32.mrf.mxu1  ;;  %v467_v61 = vpop.permute.xlu1 %466 }
 0x12c   : > { %2854 = vst [vmem:[#allocation15_spill] sm:$0xff] %v2335_v62 }
 0x12d   : > { %659 = vmatmul.f32.gmra.mxu0 %v251_v63 }
 0x12e   : > { %820 = vmatmul.f32.gmra.mxu1 %v251_v63  ;;  %v262_v63 = vld [vmem:[%s2839_s1 + $0x138] sm:$0xff] }
 0x132   : > { %v2346_v2 = vpop.f32.mrf.mxu0 }
 0x133   : > { %2855 = vst [vmem:[#allocation16_spill] sm:$0xff] %v2346_v2  ;;  %v2348_v3 = vpop.f32.mrf.mxu1 }
 0x134   : > { %2856 = vst [vmem:[#allocation17_spill] sm:$0xff] %v2348_v3  ;;  %v270_v3 = vld [vmem:[%s2839_s1 + $0x178] sm:$0xff] }
 0x135   : > { %662 = vmatmul.f32.gmra.mxu0 %v252_v4 }
 0x136   : > { %823 = vmatmul.f32.gmra.mxu1 %v252_v4  ;;  %v263_v4 = vld [vmem:[%s2839_s1 + $0x140] sm:$0xff] }
 0x13a   : > { %v2356_v6 = vpop.f32.mrf.mxu0 }
 0x13b   : > { %2857 = vst [vmem:[#allocation18_spill] sm:$0xff] %v2356_v6  ;;  %v2358_v7 = vpop.f32.mrf.mxu1 }
 0x13c   : > { %2858 = vst [vmem:[#allocation19_spill] sm:$0xff] %v2358_v7 }
 0x13d   : > { %665 = vmatmul.f32.gmra.mxu0 %v253_v8 }
 0x13e   : > { %826 = vmatmul.f32.gmra.mxu1 %v253_v8 }
 0x142   : > { %v2363_v9 = vpop.f32.mrf.mxu0 }
 0x143   : > { %2859 = vst [vmem:[#allocation20_spill] sm:$0xff] %v2363_v9  ;;  %v2365_v10 = vpop.f32.mrf.mxu1 }
 0x144   : > { %2860 = vst [vmem:[#allocation21_spill] sm:$0xff] %v2365_v10 }
 0x145   : > { %668 = vmatmul.f32.gmra.mxu0 %v254_v11 }
 0x146   : > { %829 = vmatmul.f32.gmra.mxu1 %v254_v11  ;;  %v264_v11 = vld [vmem:[%s2839_s1 + $0x148] sm:$0xff] }
 0x14a   : > { %v2370_v12 = vpop.f32.mrf.mxu0 }
 0x14b   : > { %v2372_v13 = vpop.f32.mrf.mxu1 }
 0x14d   : > { %671 = vmatmul.f32.gmra.mxu0 %v255_v14 }
 0x14e   : > { %832 = vmatmul.f32.gmra.mxu1 %v255_v14 }
 0x152   : > { %v2380_v16 = vpop.f32.mrf.mxu0 }
 0x153   : > { %v2382_v19 = vpop.f32.mrf.mxu1 }
 0x155   : > { %674 = vmatmul.f32.gmra.mxu0 %v256_v22 }
 0x156   : > { %835 = vmatmul.f32.gmra.mxu1 %v256_v22  ;;  %v265_v22 = vld [vmem:[%s2839_s1 + $0x150] sm:$0xff] }
 0x15a   : > { %v2390_v28 = vpop.f32.mrf.mxu0 }
 0x15b   : > { %v2392_v31 = vpop.f32.mrf.mxu1 }
 0x15d   : > { %677 = vmatmul.f32.gmra.mxu0 %v257_v34 }
 0x15e   : > { %838 = vmatmul.f32.gmra.mxu1 %v257_v34 }
 0x162   : > { %v2397_v37 = vpop.f32.mrf.mxu0 }
 0x163   : > { %v2399_v38 = vpop.f32.mrf.mxu1 }
 0x165   : > { %680 = vmatmul.f32.gmra.mxu0 %v258_v41 }
 0x166   : > { %841 = vmatmul.f32.gmra.mxu1 %v258_v41  ;;  %v266_v41 = vld [vmem:[%s2839_s1 + $0x158] sm:$0xff] }
 0x16a   : > { %v2404_v42 = vpop.f32.mrf.mxu0 }
 0x16b   : > { %v2406_v45 = vpop.f32.mrf.mxu1 }
 0x16d   : > { %683 = vmatmul.f32.gmra.mxu0 %v259_v46 }
 0x16e   : > { %844 = vmatmul.f32.gmra.mxu1 %v259_v46 }
 0x172   : > { %v2411_v49 = vpop.f32.mrf.mxu0 }
 0x173   : > { %v2413_v50 = vpop.f32.mrf.mxu1 }
 0x175   : > { %686 = vmatmul.f32.gmra.mxu0 %v260_v53 }
 0x176   : > { %847 = vmatmul.f32.gmra.mxu1 %v260_v53 }
 0x17a   : > { %v2418_v54 = vpop.f32.mrf.mxu0 }
 0x17b   : > { %v2420_v55 = vpop.f32.mrf.mxu1 }
 0x17d   : > { %689 = vmatmul.f32.gmra.mxu0 %v261_v58 }
 0x17e   : > { %850 = vmatmul.f32.gmra.mxu1 %v261_v58  ;;  %v267_v58 = vld [vmem:[%s2839_s1 + $0x160] sm:$0xff] }
 0x182   : > { %v2425_v59 = vpop.f32.mrf.mxu0 }
 0x183   : > { %v2427_v60 = vpop.f32.mrf.mxu1 }
 0x185   : > { %692 = vmatmul.f32.gmra.mxu0 %v262_v63 }
 0x186   : > { %853 = vmatmul.f32.gmra.mxu1 %v262_v63 }
 0x18a   : > { %v2432_v0 = vpop.f32.mrf.mxu0 }
 0x18b   : > { %v2434_v1 = vpop.f32.mrf.mxu1 }
 0x18d   : > { %695 = vmatmul.f32.gmra.mxu0 %v263_v4 }
 0x18e   : > { %856 = vmatmul.f32.gmra.mxu1 %v263_v4 }
 0x192   : > { %v2439_v5 = vpop.f32.mrf.mxu0 }
 0x193   : > { %v2441_v8 = vpop.f32.mrf.mxu1 }
 0x195   : > { %698 = vmatmul.f32.gmra.mxu0 %v264_v11 }
 0x196   : > { %859 = vmatmul.f32.gmra.mxu1 %v264_v11  ;;  %v268_v11 = vld [vmem:[%s2839_s1 + $0x168] sm:$0xff] }
 0x19a   : > { %v654_v14 = vpop.f32.mrf.mxu0 }
 0x19b   : > { %v815_v15 = vpop.f32.mrf.mxu1 }
 0x19d   : > { %701 = vmatmul.f32.gmra.mxu0 %v265_v22 }
 0x19e   : > { %862 = vmatmul.f32.gmra.mxu1 %v265_v22  ;;  %v477_v22 = vpop.permute.xlu0 %476 }
 0x1a2   : > { %v657_v25 = vpop.f32.mrf.mxu0 }
 0x1a3   : > { %v818_v34 = vpop.f32.mrf.mxu1 }
 0x1a5   : > { %704 = vmatmul.f32.gmra.mxu0 %v266_v41 }
 0x1a6   : > { %865 = vmatmul.f32.gmra.mxu1 %v266_v41  ;;  %v269_v41 = vld [vmem:[%s2839_s1 + $0x170] sm:$0xff]  ;;  %v472_v7 = vpop.permute.xlu0 %471 }
 0x1aa   : > { %v660_v46 = vpop.f32.mrf.mxu0 }
 0x1ab   : > { %v821_v53 = vpop.f32.mrf.mxu1 }
 0x1ad   : > { %707 = vmatmul.f32.gmra.mxu0 %v267_v58 }
 0x1ae   : > { %868 = vmatmul.f32.gmra.mxu1 %v267_v58  ;;  %v447_v56 = vpop.permute.xlu0 %446 }
 0x1b2   : > { %v663_v63 = vpop.f32.mrf.mxu0 }
 0x1b3   : > { %v824_v4 = vpop.f32.mrf.mxu1  ;;  %v664_v51 = vadd.f32 %v663_v63, %v467_v61 }
 0x1b4   : > { %v825_v48 = vadd.f32 %v824_v4, %v467_v61 }
 0x1b5   : > { %710 = vmatmul.f32.gmra.mxu0 %v268_v11 }
 0x1b6   : > { %871 = vmatmul.f32.gmra.mxu1 %v268_v11 }
 0x1ba   : > { %v666_v10 = vpop.f32.mrf.mxu0 }
 0x1bb   : > { %v827_v9 = vpop.f32.mrf.mxu1  ;;  %v667_v11 = vadd.f32 %v666_v10, %v472_v7 }
 0x1bc   : > { %v828_v57 = vadd.f32 %v827_v9, %v472_v7  ;;  %v819_v7 = vadd.f32 %v818_v34, %v457_v47  ;;  %v452_v9 = vpop.permute.xlu2 %451 }
 0x1bd   : > { %713 = vmatmul.f32.gmra.mxu0 %v269_v41  ;;  %v655_v10 = vadd.f32 %v654_v14, %v452_v9  ;;  %v816_v61 = vadd.f32 %v815_v15, %v452_v9 }
 0x1be   : > { %874 = vmatmul.f32.gmra.mxu1 %v269_v41 }
 0x1c2   : > { %v669_v6 = vpop.f32.mrf.mxu0 }
 0x1c3   : > { %v830_v58 = vpop.f32.mrf.mxu1  ;;  %v670_v2 = vadd.f32 %v669_v6, %v477_v22  ;;  %v462_v6 = vpop.permute.xlu1 %461 }
 0x1c4   : > { %v831_v62 = vadd.f32 %v830_v58, %v477_v22  ;;  %v661_v22 = vadd.f32 %v660_v46, %v462_v6  ;;  %v822_v58 = vadd.f32 %v821_v53, %v462_v6  ;;  %v652_v46 = vadd.f32 %v2439_v5, %v447_v56  ;;  %v437_v4 = vpop.permute.xlu2 %436 }
 0x1c5   : > { %716 = vmatmul.f32.gmra.mxu0 %v270_v3  ;;  %881 = vmatpush.xpose.msra.mxu2 %v670_v2  ;;  %v813_v53 = vadd.f32 %v2441_v8, %v447_v56  ;;  %v807_v5 = vadd.f32 %v2427_v60, %v437_v4 }
 0x1c6   : > { %877 = vmatmul.f32.gmra.mxu1 %v270_v3  ;;  %946 = vmatpush.xpose.msra.mxu3 %v831_v62  ;;  %v432_v3 = vpop.permute.xlu0 %431 }
 0x1c7   : > { %v643_v8 = vadd.f32 %v2418_v54, %v432_v3 }
 0x1c9   : > { %882 = vmatpush.xpose.msra.mxu2 %v667_v11  ;;  %v646_v11 = vadd.f32 %v2425_v59, %v437_v4 }
 0x1ca   : > { %947 = vmatpush.xpose.msra.mxu3 %v828_v57  ;;  %v2464_v41 = vpop.f32.mrf.mxu0  ;;  %v658_v57 = vadd.f32 %v657_v25, %v457_v47 }
 0x1cb   : > { %v2466_v52 = vpop.f32.mrf.mxu1  ;;  %v442_v25 = vpop.permute.xlu1 %441 }
 0x1cc   : > { %v649_v47 = vadd.f32 %v2432_v0, %v442_v25  ;;  %v810_v34 = vadd.f32 %v2434_v1, %v442_v25  ;;  %v804_v0 = vadd.f32 %v2420_v55, %v432_v3  ;;  %v422_v60 = vpop.permute.xlu2 %421 }
 0x1cd   : > { %883 = vmatpush.xpose.msra.mxu2 %v664_v51  ;;  %v798_v54 = vadd.f32 %v2406_v45, %v422_v60 }
 0x1ce   : > { %948 = vmatpush.xpose.msra.mxu3 %v825_v48  ;;  %v417_v63 = vpop.permute.xlu0 %416 }
 0x1cf   : > { %v634_v9 = vadd.f32 %v2397_v37, %v417_v63 }
 0x1d1   : > { %884 = vmatpush.xpose.msra.mxu2 %v661_v22 }
 0x1d2   : > { %949 = vmatpush.xpose.msra.mxu3 %v822_v58  ;;  %v2468_v62 = vpop.f32.mrf.mxu0 }
 0x1d3   : > { %v2470_v2 = vpop.f32.mrf.mxu1  ;;  %v427_v22 = vpop.permute.xlu1 %426 }
 0x1d4   : > { %v640_v58 = vadd.f32 %v2411_v49, %v427_v22  ;;  %v801_v59 = vadd.f32 %v2413_v50, %v427_v22  ;;  %v795_v49 = vadd.f32 %v2399_v38, %v417_v63 }
 0x1d5   : > { %885 = vmatpush.xpose.msra.mxu2 %v658_v57  ;;  %v637_v57 = vadd.f32 %v2404_v42, %v422_v60 }
 0x1d6   : > { %950 = vmatpush.xpose.msra.mxu3 %v819_v7  ;;  %v402_v56 = vpop.permute.xlu0 %401 }
 0x1d7   : > { %v625_v63 = vadd.f32 %v2370_v12, %v402_v56 }
 0x1d9   : > { %886 = vmatpush.xpose.msra.mxu2 %v655_v10 }
 0x1da   : > { %951 = vmatpush.xpose.msra.mxu3 %v816_v61  ;;  %v2472_v48 = vpop.f32.mrf.mxu0 }
 0x1db   : > { %v2474_v51 = vpop.f32.mrf.mxu1  ;;  %v412_v10 = vpop.permute.xlu1 %411 }
 0x1dc   : > { %v631_v50 = vadd.f32 %v2390_v28, %v412_v10  ;;  %v792_v42 = vadd.f32 %v2392_v31, %v412_v10  ;;  %v786_v28 = vadd.f32 %v2372_v13, %v402_v56 }
 0x1dd   : > { %887 = vmatpush.xpose.msra.mxu2 %v652_v46 }
 0x1de   : > { %952 = vmatpush.xpose.msra.mxu3 %v813_v53  ;;  %v332_v7 = vpop.permute.xlu0 %331  ;;  %v407_v53 = vpop.permute.xlu2 %406 }
 0x1df   : > { %v628_v25 = vadd.f32 %v2380_v16, %v407_v53  ;;  %v789_v37 = vadd.f32 %v2382_v19, %v407_v53  ;;  %v744_v22 = vadd.f32 %v2241_v24, %v332_v7 }
 0x1e1   : > { %888 = vmatpush.xpose.msra.mxu2 %v649_v47 }
 0x1e2   : > { %953 = vmatpush.xpose.msra.mxu3 %v810_v34  ;;  %v2480_v14 = vpop.f32.mrf.mxu0 }
 0x1e3   : > { %v2482_v15 = vpop.f32.mrf.mxu1  ;;  %v322_v38 = vpop.permute.xlu1 %321 }
 0x1e4   : > { %v577_v4 = vadd.f32 %v2225_v17, %v322_v38  ;;  %v738_v16 = vadd.f32 %v2227_v18, %v322_v38 }
 0x1e5   : > { %889 = vmatpush.xpose.msra.mxu2 %v646_v11 }
 0x1e6   : > { %954 = vmatpush.xpose.msra.mxu3 %v807_v5  ;;  %v347_v61 = vpop.permute.xlu0 %346  ;;  %v327_v19 = vpop.permute.xlu2 %326 }
 0x1e7   : > { %v580_v5 = vadd.f32 %v2232_v20, %v327_v19  ;;  %v741_v56 = vadd.f32 %v2234_v21, %v327_v19 }
 0x1e9   : > { %890 = vmatpush.xpose.msra.mxu2 %v643_v8 }
 0x1ea   : > { %955 = vmatpush.xpose.msra.mxu3 %v804_v0  ;;  %v2488_v1 = vpop.f32.mrf.mxu0  ;;  %v583_v0 = vadd.f32 %v2239_v23, %v332_v7 }
 0x1eb   : > { %v2490_v6 = vpop.f32.mrf.mxu1 }
 0x1ed   : > { %891 = vmatpush.xpose.msra.mxu2 %v640_v58  ;;  %v337_v58 = vpop.permute.xlu1 %336 }
 0x1ee   : > { %956 = vmatpush.xpose.msra.mxu3 %v801_v59  ;;  %v2512_v31 = vpop.permute.xlu0 %361  ;;  %v586_v21 = vadd.f32 %v2246_v26, %v337_v58  ;;  %v592_v26 = vadd.f32 %v2260_v32, %v347_v61 }
 0x1f1   : > { %892 = vmatpush.xpose.msra.mxu2 %v637_v57  ;;  %v747_v57 = vadd.f32 %v2248_v27, %v337_v58  ;;  %v753_v27 = vadd.f32 %v2262_v33, %v347_v61 }
 0x1f2   : > { %957 = vmatpush.xpose.msra.mxu3 %v798_v54  ;;  %v2496_v55 = vpop.f32.mrf.mxu0 }
 0x1f3   : > { %v2498_v3 = vpop.f32.mrf.mxu1 }
 0x1f5   : > { %893 = vmatpush.xpose.msra.mxu2 %v634_v9  ;;  %v352_v54 = vpop.permute.xlu1 %351  ;;  %v342_v9 = vpop.permute.xlu2 %341 }
 0x1f6   : > { %958 = vmatpush.xpose.msra.mxu3 %v795_v49  ;;  %v2520_v11 = vpop.permute.xlu0 %376  ;;  %v589_v24 = vadd.f32 %v2253_v29, %v342_v9  ;;  %v750_v7 = vadd.f32 %v2255_v30, %v342_v9  ;;  %v595_v29 = vadd.f32 %v2267_v35, %v352_v54  ;;  %v756_v30 = vadd.f32 %v2269_v36, %v352_v54 }
 0x1f7   : > { %v762_v54 = vadd.f32 %v2289_v44, %v2512_v31  ;;  %v2862_v44 = vld [vmem:[#allocation9_spill] sm:$0xff] }
 0x1f9   : > { %894 = vmatpush.xpose.msra.mxu2 %v631_v50 }
 0x1fa   : > { %959 = vmatpush.xpose.msra.mxu3 %v792_v42  ;;  %v2504_v45 = vpop.f32.mrf.mxu0 }
 0x1fb   : > { %v2506_v46 = vpop.f32.mrf.mxu1 }
 0x1fd   : > { %895 = vmatpush.xpose.msra.mxu2 %v628_v25  ;;  %v367_v50 = vpop.permute.xlu1 %366  ;;  %v357_v38 = vpop.permute.xlu2 %356 }
 0x1fe   : > { %960 = vmatpush.xpose.msra.mxu3 %v789_v37  ;;  %v2528_v8 = vpop.permute.xlu0 %391  ;;  %v598_v61 = vadd.f32 %v2277_v39, %v357_v38 }
 0x201   : > { %896 = vmatpush.xpose.msra.mxu2 %v625_v63 }
 0x202   : > { %961 = vmatpush.xpose.msra.mxu3 %v786_v28  ;;  %v2514_v47 = vpop.f32.mrf.mxu0 }
 0x203   : > { %v2516_v34 = vpop.f32.mrf.mxu1 }
 0x204   : > { %897 = vmatmul.f32.vlgmr.msra.gmra.mxu2 %v577_v4 }
 0x205   : > { %962 = vmatmul.f32.vlgmr.msra.gmra.mxu3 %v738_v16  ;;  %v2546_v25 = vpop.permute.xlu1 %381  ;;  %v372_v16 = vpop.permute.xlu2 %371 }
 0x206   : > { %v557_v59 = vpop.permute.xlu0 %556 }
 0x20a   : > { %v2522_v12 = vpop.f32.mrf.mxu0 }
 0x20b   : > { %v2524_v13 = vpop.f32.mrf.mxu1 }
 0x20c   : > { %900 = vmatmul.f32.gmra.mxu2 %v580_v5  ;;  %v759_v5 = vadd.f32 %v2279_v40, %v357_v38  ;;  %v2861_v38 = vld [vmem:[#allocation8_spill] sm:$0xff] }
 0x20d   : > { %965 = vmatmul.f32.gmra.mxu3 %v741_v56  ;;  %v2550_v4 = vpop.permute.xlu1 %396 }
 0x20e   : > { %v542_v10 = vpop.permute.xlu0 %541 }
 0x212   : > { %v2530_v17 = vpop.f32.mrf.mxu0 }
 0x213   : > { %v2532_v18 = vpop.f32.mrf.mxu1 }
 0x214   : > { %903 = vmatmul.f32.gmra.mxu2 %v583_v0  ;;  %v2554_v0 = vpop.permute.xlu2 %386 }
 0x215   : > { %968 = vmatmul.f32.gmra.mxu3 %v744_v22  ;;  %v552_v56 = vpop.permute.xlu1 %551 }
 0x216   : > { %v532_v37 = vpop.permute.xlu0 %531 }
 0x21a   : > { %v2536_v60 = vpop.f32.mrf.mxu0 }
 0x21b   : > { %v2538_v20 = vpop.f32.mrf.mxu1 }
 0x21c   : > { %906 = vmatmul.f32.gmra.mxu2 %v586_v21 }
 0x21d   : > { %971 = vmatmul.f32.gmra.mxu3 %v747_v57  ;;  %v601_v57 = vadd.f32 %v2287_v43, %v2512_v31  ;;  %v537_v9 = vpop.permute.xlu1 %536  ;;  %v765_v31 = vadd.f32 %v2862_v44, %v367_v50 }
 0x21e   : > { %v527_v32 = vpop.permute.xlu0 %526 }
 0x222   : > { %v705_v49 = vpop.f32.mrf.mxu0 }
 0x223   : > { %v866_v23 = vpop.f32.mrf.mxu1 }
 0x224   : > { %909 = vmatmul.f32.gmra.mxu2 %v589_v24  ;;  %v547_v24 = vpop.permute.xlu2 %546 }
 0x225   : > { %974 = vmatmul.f32.gmra.mxu3 %v750_v7 }
 0x226   : > { %v522_v35 = vpop.permute.xlu0 %521 }
 0x22a   : > { %v708_v42 = vpop.f32.mrf.mxu0 }
 0x22b   : > { %v869_v53 = vpop.f32.mrf.mxu1 }
 0x22c   : > { %912 = vmatmul.f32.gmra.mxu2 %v592_v26 }
 0x22d   : > { %977 = vmatmul.f32.gmra.mxu3 %v753_v27  ;;  %v709_v27 = vadd.f32 %v708_v42, %v542_v10  ;;  %v861_v42 = vadd.f32 %v2532_v18, %v527_v32 }
 0x22e   : > { %v517_v43 = vpop.permute.xlu0 %516 }
 0x232   : > { %v711_v63 = vpop.f32.mrf.mxu0 }
 0x233   : > { %v872_v28 = vpop.f32.mrf.mxu1  ;;  %v712_v7 = vadd.f32 %v711_v63, %v547_v24  ;;  %v703_v63 = vadd.f32 %v2536_v60, %v532_v37  ;;  %v2864_v60 = vld [vmem:[#allocation11_spill] sm:$0xff] }
 0x234   : > { %915 = vmatmul.f32.gmra.mxu2 %v595_v29  ;;  %v873_v26 = vadd.f32 %v872_v28, %v547_v24  ;;  %v604_v29 = vadd.f32 %v2861_v38, %v367_v50  ;;  %v864_v28 = vadd.f32 %v2538_v20, %v532_v37  ;;  %v2863_v50 = vld [vmem:[#allocation10_spill] sm:$0xff]  ;;  %v694_v20 = vadd.f32 %v2514_v47, %v517_v43  ;;  %v502_v47 = vpop.permute.xlu2 %501 }
 0x235   : > { %980 = vmatmul.f32.gmra.mxu3 %v756_v30  ;;  %v706_v30 = vadd.f32 %v705_v49, %v537_v9  ;;  %v697_v49 = vadd.f32 %v2522_v12, %v522_v35  ;;  %v855_v37 = vadd.f32 %v2516_v34, %v517_v43  ;;  %v685_v34 = vadd.f32 %v2488_v1, %v502_v47  ;;  %v2867_v1 = vld [vmem:[#allocation14_spill] sm:$0xff] }
 0x23a   : > { %v714_v19 = vpop.f32.mrf.mxu0 }
 0x23b   : > { %v875_v33 = vpop.f32.mrf.mxu1  ;;  %v715_v39 = vadd.f32 %v714_v19, %v552_v56  ;;  %v867_v19 = vadd.f32 %v866_v23, %v537_v9  ;;  %v858_v23 = vadd.f32 %v2524_v13, %v522_v35  ;;  %v2874_v9 = vld [vmem:[#allocation21_spill] sm:$0xff] }
 0x23c   : > { %918 = vmatmul.f32.gmra.mxu2 %v598_v61  ;;  %v876_v40 = vadd.f32 %v875_v33, %v552_v56  ;;  %v607_v33 = vadd.f32 %v2863_v50, %v372_v16  ;;  %v768_v61 = vadd.f32 %v2864_v60, %v372_v16  ;;  %v846_v16 = vadd.f32 %v2490_v6, %v502_v47 }
 0x23d   : > { %983 = vmatmul.f32.gmra.mxu3 %v759_v5  ;;  %v613_v6 = vadd.f32 %v2867_v1, %v2546_v25  ;;  %v783_v24 = vadd.f32 %v2874_v9, %v2550_v4 }
 0x242   : > { %v717_v22 = vpop.f32.mrf.mxu0 }
 0x243   : > { %v878_v36 = vpop.f32.mrf.mxu1  ;;  %v718_v58 = vadd.f32 %v717_v22, %v557_v59  ;;  %v2868_v22 = vld [vmem:[#allocation15_spill] sm:$0xff] }
 0x244   : > { %v879_v21 = vadd.f32 %v878_v36, %v557_v59  ;;  %921 = vmatmul.f32.gmra.mxu2 %v601_v57  ;;  %v870_v59 = vadd.f32 %v869_v53, %v542_v10  ;;  %v700_v10 = vadd.f32 %v2530_v17, %v527_v32  ;;  %v507_v53 = vpop.permute.xlu1 %506  ;;  %v512_v17 = vpop.permute.xlu0 %511  ;;  %v774_v36 = vadd.f32 %v2868_v22, %v2546_v25  ;;  %v2873_v25 = vld [vmem:[#allocation20_spill] sm:$0xff] }
 0x245   : > { %986 = vmatmul.f32.gmra.mxu3 %v762_v54  ;;  %1379 = vmatpush.msrb.mxu2 %v718_v58  ;;  %v691_v18 = vadd.f32 %v2504_v45, %v512_v17  ;;  %v852_v12 = vadd.f32 %v2506_v46, %v512_v17  ;;  %v688_v13 = vadd.f32 %v2496_v55, %v507_v53  ;;  %v2865_v45 = vld [vmem:[#allocation12_spill] sm:$0xff]  ;;  %v2866_v46 = vld [vmem:[#allocation13_spill] sm:$0xff]  ;;  %v2872_v54 = vld [vmem:[#allocation19_spill] sm:$0xff] }
 0x246   : > { %1444 = vmatpush.msrb.mxu3 %v879_v21  ;;  %v849_v32 = vadd.f32 %v2498_v3, %v507_v53  ;;  %v610_v56 = vadd.f32 %v2865_v45, %v2520_v11  ;;  %v771_v35 = vadd.f32 %v2866_v46, %v2520_v11  ;;  %v2869_v11 = vld [vmem:[#allocation16_spill] sm:$0xff]  ;;  %v2871_v21 = vld [vmem:[#allocation18_spill] sm:$0xff] }
 0x247   : > { %1380 = vmatpush.msrb.mxu2 %v715_v39  ;;  %v616_v58 = vadd.f32 %v2869_v11, %v2554_v0  ;;  %v619_v57 = vadd.f32 %v2871_v21, %v2528_v8  ;;  %v780_v39 = vadd.f32 %v2872_v54, %v2528_v8 }
 0x248   : > { %1445 = vmatpush.msrb.mxu3 %v876_v40  ;;  %v622_v40 = vadd.f32 %v2873_v25, %v2550_v4 }
 0x249   : > { %1381 = vmatpush.msrb.mxu2 %v712_v7 }
 0x24a   : > { %1446 = vmatpush.msrb.mxu3 %v873_v26 }
 0x24b   : > { %1382 = vmatpush.msrb.mxu2 %v709_v27 }
 0x24c   : > { %1447 = vmatpush.msrb.mxu3 %v870_v59  ;;  %924 = vmatmul.f32.gmra.mxu2 %v604_v29  ;;  %v497_v5 = vpop.permute.xlu1 %496 }
 0x24d   : > { %989 = vmatmul.f32.gmra.mxu3 %v765_v31  ;;  %1383 = vmatpush.msrb.mxu2 %v706_v30  ;;  %v682_v55 = vadd.f32 %v2480_v14, %v497_v5  ;;  %v843_v3 = vadd.f32 %v2482_v15, %v497_v5  ;;  %v2870_v14 = vld [vmem:[#allocation17_spill] sm:$0xff] }
 0x24e   : > { %1448 = vmatpush.msrb.mxu3 %v867_v19  ;;  %v777_v15 = vadd.f32 %v2870_v14, %v2554_v0 }
 0x24f   : > { %1384 = vmatpush.msrb.mxu2 %v703_v63 }
 0x250   : > { %1449 = vmatpush.msrb.mxu3 %v864_v28 }
 0x251   : > { %1385 = vmatpush.msrb.mxu2 %v700_v10 }
 0x252   : > { %1450 = vmatpush.msrb.mxu3 %v861_v42 }
 0x253   : > { %1386 = vmatpush.msrb.mxu2 %v697_v49 }
 0x254   : > { %1451 = vmatpush.msrb.mxu3 %v858_v23  ;;  %927 = vmatmul.f32.gmra.mxu2 %v607_v33 }
 0x255   : > { %992 = vmatmul.f32.gmra.mxu3 %v768_v61  ;;  %1387 = vmatpush.msrb.mxu2 %v694_v20 }
 0x256   : > { %1452 = vmatpush.msrb.mxu3 %v855_v37 }
 0x257   : > { %1388 = vmatpush.msrb.mxu2 %v691_v18 }
 0x258   : > { %1453 = vmatpush.msrb.mxu3 %v852_v12 }
 0x259   : > { %1389 = vmatpush.msrb.mxu2 %v688_v13  ;;  %v305_v13 = vld [vmem:[%s2840_s2 + $0x110] sm:$0xff] }
 0x25a   : > { %1454 = vmatpush.msrb.mxu3 %v849_v32  ;;  %v303_v32 = vld [vmem:[%s2840_s2 + $0x100] sm:$0xff] }
 0x25b   : > { %1390 = vmatpush.msrb.mxu2 %v685_v34 }
 0x25c   : > { %1455 = vmatpush.msrb.mxu3 %v846_v16  ;;  %930 = vmatmul.f32.gmra.mxu2 %v610_v56 }
 0x25d   : > { %995 = vmatmul.f32.gmra.mxu3 %v771_v35  ;;  %1391 = vmatpush.msrb.mxu2 %v682_v55 }
 0x25e   : > { %1456 = vmatpush.msrb.mxu3 %v843_v3 }
 0x264   : > { %933 = vmatmul.f32.gmra.mxu2 %v613_v6 }
 0x265   : > { %998 = vmatmul.f32.gmra.mxu3 %v774_v36 }
 0x26c   : > { %936 = vmatmul.f32.gmra.mxu2 %v616_v58 }
 0x26d   : > { %1001 = vmatmul.f32.gmra.mxu3 %v777_v15 }
 0x274   : > { %939 = vmatmul.f32.gmra.mxu2 %v619_v57 }
 0x275   : > { %1004 = vmatmul.f32.gmra.mxu3 %v780_v39 }
 0x27c   : > { %942 = vmatmul.f32.gmra.mxu2 %v622_v40 }
 0x27d   : > { %1007 = vmatmul.f32.gmra.mxu3 %v783_v24  ;;  %v304_v24 = vld [vmem:[%s2840_s2 + $0x108] sm:$0xff] }
 0x287   : > { %v898_v7 = vpop.f32.mrf.mxu2 }
 0x288   : > { %v963_v0 = vpop.f32.mrf.mxu3 }
 0x289   : > { %v964_v26 = vadd.f32 %v963_v0, %v898_v7 }
 0x28b   : > { %1011 = vmax.xlane.f32.xlu2 %v964_v26 }
 0x28f   : > { %v901_v27 = vpop.f32.mrf.mxu2 }
 0x290   : > { %v966_v59 = vpop.f32.mrf.mxu3 }
 0x291   : > { %v967_v43 = vadd.f32 %v966_v59, %v901_v27 }
 0x293   : > { %1013 = vmax.xlane.f32.xlu0 %v967_v43 }
 0x297   : > { %v904_v38 = vpop.f32.mrf.mxu2 }
 0x298   : > { %v969_v8 = vpop.f32.mrf.mxu3 }
 0x299   : > { %v970_v29 = vadd.f32 %v969_v8, %v904_v38 }
 0x29b   : > { %1015 = vmax.xlane.f32.xlu1 %v970_v29 }
 0x29f   : > { %v907_v44 = vpop.f32.mrf.mxu2 }
 0x2a0   : > { %v972_v31 = vpop.f32.mrf.mxu3 }
 0x2a1   : > { %v973_v30 = vadd.f32 %v972_v31, %v907_v44 }
 0x2a3   : > { %1017 = vmax.xlane.f32.xlu2 %v973_v30 }
 0x2a7   : > { %v910_v19 = vpop.f32.mrf.mxu2 }
 0x2a8   : > { %v975_v4 = vpop.f32.mrf.mxu3 }
 0x2a9   : > { %v2600_v63 = vadd.f32 %v975_v4, %v910_v19 }
 0x2ab   : > { %1019 = vmax.xlane.f32.xlu2 %v2600_v63 }
 0x2af   : > { %v913_v28 = vpop.f32.mrf.mxu2 }
 0x2b0   : > { %v978_v10 = vpop.f32.mrf.mxu3 }
 0x2b1   : > { %v2603_v42 = vadd.f32 %v978_v10, %v913_v28 }
 0x2b3   : > { %1021 = vmax.xlane.f32.xlu2 %v2603_v42 }
 0x2b7   : > { %v916_v53 = vpop.f32.mrf.mxu2 }
 0x2b8   : > { %v981_v49 = vpop.f32.mrf.mxu3 }
 0x2b9   : > { %v2606_v23 = vadd.f32 %v981_v49, %v916_v53 }
 0x2bb   : > { %1023 = vmax.xlane.f32.xlu1 %v2606_v23 }
 0x2bf   : > { %v919_v50 = vpop.f32.mrf.mxu2 }
 0x2c0   : > { %v984_v33 = vpop.f32.mrf.mxu3 }
 0x2c1   : > { %v985_v60 = vadd.f32 %v984_v33, %v919_v50 }
 0x2c3   : > { %1025 = vmax.xlane.f32.xlu0 %v985_v60 }
 0x2c7   : > { %v922_v61 = vpop.f32.mrf.mxu2 }
 0x2c8   : > { %v987_v20 = vpop.f32.mrf.mxu3 }
 0x2c9   : > { %v988_v37 = vadd.f32 %v987_v20, %v922_v61 }
 0x2cb   : > { %1027 = vmax.xlane.f32.xlu0 %v988_v37 }
 0x2cf   : > { %v925_v17 = vpop.f32.mrf.mxu2 }
 0x2d0   : > { %v990_v18 = vpop.f32.mrf.mxu3 }
 0x2d1   : > { %v2609_v12 = vadd.f32 %v990_v18, %v925_v17 }
 0x2d4   : > { %491 = vperm.xlu1 %1762, %v305_v13  }
 0x2d7   : > { %v928_v56 = vpop.f32.mrf.mxu2 }
 0x2d8   : > { %v993_v46 = vpop.f32.mrf.mxu3 }
 0x2d9   : > { %v2626_v39 = vadd.f32 %v993_v46, %v928_v56 }
 0x2df   : > { %481 = vperm.xlu0 %1761, %v303_v32   ;;  %v931_v36 = vpop.f32.mrf.mxu2 }
 0x2e0   : > { %v996_v11 = vpop.f32.mrf.mxu3 }
 0x2e1   : > { %v2635_v7 = vadd.f32 %v996_v11, %v931_v36 }
 0x2e7   : > { %v934_v57 = vpop.f32.mrf.mxu2 }
 0x2e8   : > { %v999_v54 = vpop.f32.mrf.mxu3 }
 0x2ef   : > { %v937_v40 = vpop.f32.mrf.mxu2 }
 0x2f0   : > { %v1002_v9 = vpop.f32.mrf.mxu3 }
 0x2f1   : > { %v2637_v0 = vadd.f32 %v1002_v9, %v937_v40 }
 0x2f7   : > { %v940_v38 = vpop.f32.mrf.mxu2 }
 0x2f8   : > { %v1005_v8 = vpop.f32.mrf.mxu3 }
 0x2fe   : > { %v1012_v47 = vpop.xlane.xlu2 %1011 }
 0x2ff   : > { %v1043_v34 = vsub.f32 %v964_v26, %v1012_v47  ;;  %v2641_v26 = vadd.f32 %v999_v54, %v934_v57  ;;  %v943_v4 = vpop.f32.mrf.mxu2  ;;  %v2668_v47 = vadd.f32 %v1005_v8, %v940_v38 }
 0x300   : > { %v1008_v28 = vpop.f32.mrf.mxu3 }
 0x301   : > { %v1059_v16 = vmul.f32 1.442695, %v1043_v34  ;;  %v2649_v33 = vadd.f32 %v1008_v28, %v943_v4 }
 0x303   : > { %1764 = vpow2.f32 %v1059_v16 }
 0x306   : > { %v1014_v5 = vpop.xlane.xlu0 %1013 }
 0x307   : > { %v1044_v45 = vsub.f32 %v967_v43, %v1014_v5 }
 0x309   : > { %v2617_v35 = vpop.eup %1764  ;;  %v1061_v55 = vmul.f32 1.442695, %v1044_v45 }
 0x30a   : > { %1091 = vadd.xlane.f32.xlu2 %v2617_v35 }
 0x30b   : > { %1766 = vpow2.f32 %v1061_v55 }
 0x30e   : > { %v1016_v3 = vpop.xlane.xlu1 %1015 }
 0x30f   : > { %v1045_v1 = vsub.f32 %v970_v29, %v1016_v3 }
 0x311   : > { %v2620_v6 = vpop.eup %1766  ;;  %v1063_v22 = vmul.f32 1.442695, %v1045_v1 }
 0x312   : > { %1093 = vadd.xlane.f32.xlu2 %v2620_v6 }
 0x313   : > { %1768 = vpow2.f32 %v1063_v22 }
 0x316   : > { %v1018_v58 = vpop.xlane.xlu2 %1017 }
 0x317   : > { %v1046_v14 = vsub.f32 %v973_v30, %v1018_v58 }
 0x319   : > { %v2623_v15 = vpop.eup %1768  ;;  %v1065_v21 = vmul.f32 1.442695, %v1046_v14 }
 0x31a   : > { %1095 = vadd.xlane.f32.xlu1 %v2623_v15 }
 0x31b   : > { %1770 = vpow2.f32 %v1065_v21 }
 0x31e   : > { %v1020_v53 = vpop.xlane.xlu2 %1019 }
 0x31f   : > { %v1047_v61 = vsub.f32 %v2600_v63, %v1020_v53 }
 0x321   : > { %v2628_v25 = vpop.eup %1770  ;;  %v1067_v20 = vmul.f32 1.442695, %v1047_v61 }
 0x322   : > { %1097 = vadd.xlane.f32.xlu0 %v2628_v25  ;;  %1031 = vmax.xlane.f32.xlu1 %v2626_v39 }
 0x32a   : > { %486 = vperm.xlu2 %1763, %v304_v24   ;;  %1033 = vmax.xlane.f32.xlu1 %v2635_v7 }
 0x32b   : > { %1037 = vmax.xlane.f32.xlu0 %v2637_v0 }
 0x32e   : > { %v1024_v29 = vpop.xlane.xlu1 %1023 }
 0x32f   : > { %v1049_v18 = vsub.f32 %v2606_v23, %v1024_v29 }
 0x331   : > { %v1071_v13 = vmul.f32 1.442695, %v1049_v18 }
 0x332   : > { %1035 = vmax.xlane.f32.xlu1 %v2641_v26 }
 0x336   : > { %v1026_v27 = vpop.xlane.xlu0 %1025 }
 0x337   : > { %v1050_v59 = vsub.f32 %v985_v60, %v1026_v27 }
 0x339   : > { %v1073_v43 = vmul.f32 1.442695, %v1050_v59 }
 0x33b   : > { %1772 = vpow2.f32 %v1073_v43 }
 0x33e   : > { %v1028_v44 = vpop.xlane.xlu0 %1027 }
 0x33f   : > { %v1051_v31 = vsub.f32 %v988_v37, %v1028_v44  ;;  %v1022_v37 = vpop.xlane.xlu2 %1021 }
 0x341   : > { %v2644_v30 = vpop.eup %1772  ;;  %v1075_v19 = vmul.f32 1.442695, %v1051_v31 }
 0x342   : > { %1105 = vadd.xlane.f32.xlu1 %v2644_v30 }
 0x343   : > { %1774 = vpow2.f32 %v1075_v19 }
 0x344   : > { %1776 = vpow2.f32 %v1067_v20 }
 0x346   : > { %v492_v10 = vpop.permute.xlu1 %491 }
 0x347   : > { %v679_v49 = vadd.f32 %v2472_v48, %v492_v10  ;;  %v840_v50 = vadd.f32 %v2474_v51, %v492_v10  ;;  %v1048_v48 = vsub.f32 %v2603_v42, %v1022_v37 }
 0x349   : > { %v2651_v60 = vpop.eup %1774  ;;  %1392 = vmatpush.msrb.mxu2 %v679_v49  ;;  %1457 = vmatpush.msrb.mxu3 %v840_v50  ;;  %v1069_v51 = vmul.f32 1.442695, %v1048_v48 }
 0x34a   : > { %1107 = vadd.xlane.f32.xlu0 %v2651_v60  ;;  %1041 = vmax.xlane.f32.xlu1 %v2649_v33  ;;  %v2658_v17 = vpop.eup %1776 }
 0x34b   : > { %1778 = vpow2.f32 %v1069_v51 }
 0x34c   : > { %1780 = vpow2.f32 %v1071_v13 }
 0x351   : > { %v2662_v32 = vpop.eup %1778  ;;  %v482_v1 = vpop.permute.xlu0 %481 }
 0x352   : > { %v2665_v63 = vpop.eup %1780  ;;  %v673_v9 = vadd.f32 %v2464_v41, %v482_v1  ;;  %v834_v24 = vadd.f32 %v2466_v52, %v482_v1 }
 0x353   : > { %1029 = vmax.xlane.f32.xlu2 %v2609_v12 }
 0x35b   : > { %1099 = vadd.xlane.f32.xlu2 %v2658_v17 }
 0x363   : > { %1101 = vadd.xlane.f32.xlu2 %v2662_v32 }
 0x36b   : > { %1103 = vadd.xlane.f32.xlu2 %v2665_v63 }
 0x373   : > { %1039 = vmax.xlane.f32.xlu2 %v2668_v47 }
 0x37d   : > { %v1092_v42 = vpop.xlane.xlu2 %1091 }
 0x37e   : > { %1782 = vrcp.f32 %v1092_v42  ;;  %v1134_v45 = vand.u32 2147483648, %v1092_v42  ;;  %v1132_v46 = vand.u32 2147483647, %v1092_v42  ;;  %vm1128_vm1 = vweird.f32 %v1092_v42 }
 0x380   : > { %v1135_v22 = vor.u32 1.1754944e-38, %v1134_v45  ;;  %vm1133_vm3 = vcmp.eq.f32.partialorder %v1132_v46, 8.507059e+37 }
 0x384   : > { %v1783_v34 = vpop.eup %1782 }
 0x385   : > { %v1124_v16 = vmul.f32 %v1783_v34, %v1092_v42  ;;  %v1094_v5 = vpop.xlane.xlu2 %1093  ;;  %vm1129_vm0 = vweird.f32 %v1783_v34 }
 0x386   : > { %1784 = vrcp.f32 %v1094_v5  ;;  %vm1130_vm2 = vmor %vm1128_vm1, %vm1129_vm0  ;;  %v1149_v27 = vand.u32 2147483648, %v1094_v5  ;;  %v1147_v38 = vand.u32 2147483647, %v1094_v5  ;;  %vm1143_vm5 = vweird.f32 %v1094_v5 }
 0x387   : > { %v1125_v23 = vsub.f32 1.0, %v1124_v16 }
 0x388   : > { %v1150_v8 = vor.u32 1.1754944e-38, %v1149_v27  ;;  %vm1148_vm7 = vcmp.eq.f32.partialorder %v1147_v38, 8.507059e+37 }
 0x389   : > { %v1126_v56 = vmul.f32 %v1783_v34, %v1125_v23 }
 0x38b   : > { %v1127_v55 = vadd.f32 %v1783_v34, %v1126_v56 }
 0x38c   : > { %v1785_v3 = vpop.eup %1784 }
 0x38d   : > { %v1139_v36 = vmul.f32 %v1785_v3, %v1094_v5  ;;  %v487_v11 = vpop.permute.xlu2 %486  ;;  %v1096_v58 = vpop.xlane.xlu1 %1095  ;;  %v1131_v14 = vsel %vm1130_vm2, %v1783_v34, %v1127_v55  ;;  %vm1144_vm4 = vweird.f32 %v1785_v3 }
 0x38e   : > { %1786 = vrcp.f32 %v1096_v58  ;;  %v676_v21 = vadd.f32 %v2468_v62, %v487_v11  ;;  %v837_v57 = vadd.f32 %v2470_v2, %v487_v11  ;;  %v1136_v54 = vsel %vm1133_vm3, %v1135_v22, %v1131_v14  ;;  %vm1145_vm6 = vmor %vm1143_vm5, %vm1144_vm4 }
 0x38f   : > { %v1140_v40 = vsub.f32 1.0, %v1139_v36  ;;  %v1363_v43 = vmul.f32 %v2617_v35, %v1136_v54  ;;  %v1164_v28 = vand.u32 2147483648, %v1096_v58  ;;  %v1162_v49 = vand.u32 2147483647, %v1096_v58 }
 0x390   : > { %1393 = vmatpush.msrb.mxu2 %v676_v21  ;;  %1458 = vmatpush.msrb.mxu3 %v837_v57  ;;  %vm1158_vm9 = vweird.f32 %v1096_v58 }
 0x391   : > { %v1141_v59 = vmul.f32 %v1785_v3, %v1140_v40  ;;  %v1165_v20 = vor.u32 1.1754944e-38, %v1164_v28  ;;  %vm1163_vm11 = vcmp.eq.f32.partialorder %v1162_v49, 8.507059e+37 }
 0x392   : > { %1394 = vmatpush.msrb.mxu2 %v673_v9  ;;  %1459 = vmatpush.msrb.mxu3 %v834_v24 }
 0x393   : > { %1395 = vmatmul.f32.vlgmr.msrb.gmra.mxu2 %v1363_v43  ;;  %1460 = vmatmul.f32.vlgmr.msrb.gmra.mxu3 %v1363_v43  ;;  %v1142_v62 = vadd.f32 %v1785_v3, %v1141_v59 }
 0x394   : > { %v1787_v2 = vpop.eup %1786 }
 0x395   : > { %v1154_v29 = vmul.f32 %v1787_v2, %v1096_v58  ;;  %v1098_v44 = vpop.xlane.xlu0 %1097  ;;  %v1032_v41 = vpop.xlane.xlu1 %1031  ;;  %v1146_v31 = vsel %vm1145_vm6, %v1785_v3, %v1142_v62  ;;  %vm1159_vm8 = vweird.f32 %v1787_v2 }
 0x396   : > { %1788 = vrcp.f32 %v1098_v44  ;;  %v1053_v52 = vsub.f32 %v2626_v39, %v1032_v41  ;;  %v1151_v35 = vsel %vm1148_vm7, %v1150_v8, %v1146_v31  ;;  %vm1160_vm10 = vmor %vm1158_vm9, %vm1159_vm8  ;;  %v1177_v5 = vand.u32 2147483647, %v1098_v44 }
 0x397   : > { %v1155_v19 = vsub.f32 1.0, %v1154_v29  ;;  %v1364_v53 = vmul.f32 %v2620_v6, %v1151_v35  ;;  %v1179_v23 = vand.u32 2147483648, %v1098_v44  ;;  %vm1173_vm13 = vweird.f32 %v1098_v44 }
 0x398   : > { %v1079_v4 = vmul.f32 1.442695, %v1053_v52  ;;  %vm1178_vm15 = vcmp.eq.f32.partialorder %v1177_v5, 8.507059e+37 }
 0x399   : > { %v1156_v10 = vmul.f32 %v1787_v2, %v1155_v19 }
 0x39a   : > { %1790 = vpow2.f32 %v1079_v4 }
 0x39b   : > { %1398 = vmatmul.f32.gmra.mxu2 %v1364_v53  ;;  %1463 = vmatmul.f32.gmra.mxu3 %v1364_v53  ;;  %v1157_v50 = vadd.f32 %v1787_v2, %v1156_v10 }
 0x39c   : > { %v1789_v61 = vpop.eup %1788 }
 0x39d   : > { %v1169_v37 = vmul.f32 %v1789_v61, %v1098_v44  ;;  %v1034_v48 = vpop.xlane.xlu1 %1033  ;;  %v1161_v39 = vsel %vm1160_vm10, %v1787_v2, %v1157_v50  ;;  %vm1174_vm12 = vweird.f32 %v1789_v61 }
 0x39e   : > { %v1054_v51 = vsub.f32 %v2635_v7, %v1034_v48  ;;  %v1038_v18 = vpop.xlane.xlu0 %1037  ;;  %v1166_v13 = vsel %vm1163_vm11, %v1165_v20, %v1161_v39  ;;  %vm1175_vm14 = vmor %vm1173_vm13, %vm1174_vm12 }
 0x39f   : > { %v1170_v42 = vsub.f32 1.0, %v1169_v37  ;;  %v1056_v6 = vsub.f32 %v2637_v0, %v1038_v18  ;;  %v1365_v46 = vmul.f32 %v2623_v15, %v1166_v13  ;;  %v1180_v0 = vor.u32 1.1754944e-38, %v1179_v23 }
 0x3a0   : > { %v2680_v34 = vpop.eup %1790  ;;  %v1081_v16 = vmul.f32 1.442695, %v1054_v51 }
 0x3a1   : > { %v1171_v45 = vmul.f32 %v1789_v61, %v1170_v42  ;;  %v1085_v56 = vmul.f32 1.442695, %v1056_v6  ;;  %1111 = vadd.xlane.f32.xlu0 %v2680_v34 }
 0x3a2   : > { %1792 = vpow2.f32 %v1081_v16 }
 0x3a3   : > { %1794 = vpow2.f32 %v1085_v56  ;;  %1401 = vmatmul.f32.gmra.mxu2 %v1365_v46  ;;  %1466 = vmatmul.f32.gmra.mxu3 %v1365_v46  ;;  %v1172_v7 = vadd.f32 %v1789_v61, %v1171_v45 }
 0x3a5   : > { %v1176_v55 = vsel %vm1175_vm14, %v1789_v61, %v1172_v7  ;;  %v1036_v36 = vpop.xlane.xlu1 %1035 }
 0x3a6   : > { %v1181_v3 = vsel %vm1178_vm15, %v1180_v0, %v1176_v55  ;;  %v1055_v57 = vsub.f32 %v2641_v26, %v1036_v36 }
 0x3a7   : > { %v1366_v15 = vmul.f32 %v2628_v25, %v1181_v3 }
 0x3a8   : > { %v2684_v1 = vpop.eup %1792  ;;  %v1083_v40 = vmul.f32 1.442695, %v1055_v57 }
 0x3a9   : > { %v2686_v22 = vpop.eup %1794  ;;  %1113 = vadd.xlane.f32.xlu1 %v2684_v1 }
 0x3aa   : > { %1117 = vadd.xlane.f32.xlu0 %v2686_v22 }
 0x3ab   : > { %1404 = vmatmul.f32.gmra.mxu2 %v1366_v15  ;;  %1469 = vmatmul.f32.gmra.mxu3 %v1366_v15 }
 0x3b5   : > { %v2691_v58 = vpop.xlane.xlu1 %1105 }
 0x3b6   : > { %vm1233_vm13 = vweird.f32 %v2691_v58  ;;  %v1237_v57 = vand.u32 2147483647, %v2691_v58 }
 0x3b8   : > { %vm1238_vm15 = vcmp.eq.f32.partialorder %v1237_v57, 8.507059e+37 }
 0x3bd   : > { %v1042_v25 = vpop.xlane.xlu1 %1041  ;;  %v2705_v31 = vpop.xlane.xlu0 %1107 }
 0x3be   : > { %v1058_v24 = vsub.f32 %v2649_v33, %v1042_v25 }
 0x3c6   : > { %v1030_v11 = vpop.xlane.xlu2 %1029 }
 0x3c7   : > { %v1052_v14 = vsub.f32 %v2609_v12, %v1030_v11  ;;  %v1089_v12 = vmul.f32 1.442695, %v1058_v24 }
 0x3c9   : > { %v1077_v21 = vmul.f32 1.442695, %v1052_v14  ;;  %v1239_v14 = vand.u32 2147483648, %v2691_v58 }
 0x3cb   : > { %1796 = vpow2.f32 %v1077_v21  ;;  %v1240_v24 = vor.u32 1.1754944e-38, %v1239_v14 }
 0x3ce   : > { %v1100_v54 = vpop.xlane.xlu2 %1099 }
 0x3cf   : > { %1798 = vrcp.f32 %v1100_v54  ;;  %v1194_v62 = vand.u32 2147483648, %v1100_v54  ;;  %v1192_v8 = vand.u32 2147483647, %v1100_v54  ;;  %vm1188_vm1 = vweird.f32 %v1100_v54 }
 0x3d0   : > { %1800 = vpow2.f32 %v1083_v40 }
 0x3d1   : > { %v2695_v9 = vpop.eup %1796  ;;  %v1195_v44 = vor.u32 1.1754944e-38, %v1194_v62  ;;  %vm1193_vm3 = vcmp.eq.f32.partialorder %v1192_v8, 8.507059e+37 }
 0x3d2   : > { %1109 = vadd.xlane.f32.xlu2 %v2695_v9 }
 0x3d5   : > { %v1799_v27 = vpop.eup %1798 }
 0x3d6   : > { %v1184_v59 = vmul.f32 %v1799_v27, %v1100_v54  ;;  %v1102_v43 = vpop.xlane.xlu2 %1101  ;;  %v2700_v38 = vpop.eup %1800  ;;  %vm1189_vm0 = vweird.f32 %v1799_v27 }
 0x3d7   : > { %1802 = vrcp.f32 %v1102_v43  ;;  %vm1190_vm2 = vmor %vm1188_vm1, %vm1189_vm0  ;;  %v1209_v49 = vand.u32 2147483648, %v1102_v43  ;;  %v1207_v20 = vand.u32 2147483647, %v1102_v43  ;;  %vm1203_vm5 = vweird.f32 %v1102_v43 }
 0x3d8   : > { %1804 = vrcp.f32 %v2691_v58  ;;  %v1185_v26 = vsub.f32 1.0, %v1184_v59  ;;  %vm1248_vm1 = vweird.f32 %v2705_v31 }
 0x3d9   : > { %1806 = vpow2.f32 %v1089_v12  ;;  %vm1208_vm7 = vcmp.eq.f32.partialorder %v1207_v20, 8.507059e+37 }
 0x3da   : > { %v1186_v2 = vmul.f32 %v1799_v27, %v1185_v26  ;;  %1115 = vadd.xlane.f32.xlu2 %v2700_v38 }
 0x3dc   : > { %v1187_v29 = vadd.f32 %v1799_v27, %v1186_v2 }
 0x3dd   : > { %v1803_v33 = vpop.eup %1802 }
 0x3de   : > { %v2703_v41 = vpop.eup %1804  ;;  %v1199_v52 = vmul.f32 %v1803_v33, %v1102_v43  ;;  %v1104_v35 = vpop.xlane.xlu2 %1103  ;;  %v1191_v19 = vsel %vm1190_vm2, %v1799_v27, %v1187_v29  ;;  %vm1204_vm4 = vweird.f32 %v1803_v33  ;;  %v1252_v43 = vand.u32 2147483647, %v2705_v31 }
 0x3df   : > { %1808 = vrcp.f32 %v1104_v35  ;;  %v1196_v4 = vsel %vm1193_vm3, %v1195_v44, %v1191_v19  ;;  %v1229_v53 = vmul.f32 %v2703_v41, %v2691_v58  ;;  %v2711_v50 = vpop.eup %1806  ;;  %vm1205_vm6 = vmor %vm1203_vm5, %vm1204_vm4  ;;  %v1224_v46 = vand.u32 2147483648, %v1104_v35 }
 0x3e0   : > { %v1200_v28 = vsub.f32 1.0, %v1199_v52  ;;  %v1367_v10 = vmul.f32 %v2658_v17, %v1196_v4  ;;  %1810 = vrcp.f32 %v2705_v31  ;;  %v1210_v17 = vor.u32 1.1754944e-38, %v1209_v49 }
 0x3e1   : > { %v1230_v39 = vsub.f32 1.0, %v1229_v53  ;;  %v1222_v55 = vand.u32 2147483647, %v1104_v35  ;;  %vm1218_vm9 = vweird.f32 %v1104_v35  ;;  %vm1234_vm11 = vweird.f32 %v2703_v41 }
 0x3e2   : > { %v1201_v61 = vmul.f32 %v1803_v33, %v1200_v28  ;;  %1407 = vmatmul.f32.gmra.mxu2 %v1367_v10  ;;  %1472 = vmatmul.f32.gmra.mxu3 %v1367_v10  ;;  %vm1235_vm14 = vmor %vm1233_vm13, %vm1234_vm11  ;;  %vm1253_vm3 = vcmp.eq.f32.partialorder %v1252_v43, 8.507059e+37 }
 0x3e3   : > { %1121 = vadd.xlane.f32.xlu2 %v2711_v50  ;;  %v1231_v45 = vmul.f32 %v2703_v41, %v1230_v39  ;;  %vm1223_vm12 = vcmp.eq.f32.partialorder %v1222_v55, 8.507059e+37 }
 0x3e4   : > { %v1202_v37 = vadd.f32 %v1803_v33, %v1201_v61 }
 0x3e5   : > { %v1809_v48 = vpop.eup %1808  ;;  %v1232_v36 = vadd.f32 %v2703_v41, %v1231_v45 }
 0x3e6   : > { %v1214_v51 = vmul.f32 %v1809_v48, %v1104_v35  ;;  %v1040_v18 = vpop.xlane.xlu2 %1039  ;;  %v1206_v13 = vsel %vm1205_vm6, %v1803_v33, %v1202_v37  ;;  %v1811_v42 = vpop.eup %1810  ;;  %vm1219_vm8 = vweird.f32 %v1809_v48 }
 0x3e7   : > { %v1057_v6 = vsub.f32 %v2668_v47, %v1040_v18  ;;  %v1211_v16 = vsel %vm1208_vm7, %v1210_v17, %v1206_v13  ;;  %v1244_v7 = vmul.f32 %v1811_v42, %v2705_v31  ;;  %vm1220_vm10 = vmor %vm1218_vm9, %vm1219_vm8  ;;  %v1225_v47 = vor.u32 1.1754944e-38, %v1224_v46 }
 0x3e8   : > { %v1215_v5 = vsub.f32 1.0, %v1214_v51  ;;  %v1368_v23 = vmul.f32 %v2662_v32, %v1211_v16  ;;  %v1236_v25 = vsel %vm1235_vm14, %v2703_v41, %v1232_v36  ;;  %vm1249_vm0 = vweird.f32 %v1811_v42 }
 0x3e9   : > { %v1087_v56 = vmul.f32 1.442695, %v1057_v6  ;;  %v1245_v15 = vsub.f32 1.0, %v1244_v7  ;;  %v1241_v27 = vsel %vm1238_vm15, %v1240_v24, %v1236_v25  ;;  %vm1250_vm2 = vmor %vm1248_vm1, %vm1249_vm0 }
 0x3ea   : > { %v1216_v0 = vmul.f32 %v1809_v48, %v1215_v5  ;;  %1410 = vmatmul.f32.gmra.mxu2 %v1368_v23  ;;  %1475 = vmatmul.f32.gmra.mxu3 %v1368_v23  ;;  %v1370_v58 = vmul.f32 %v2644_v30, %v1241_v27 }
 0x3eb   : > { %1812 = vpow2.f32 %v1087_v56  ;;  %v1246_v40 = vmul.f32 %v1811_v42, %v1245_v15 }
 0x3ec   : > { %v1217_v3 = vadd.f32 %v1809_v48, %v1216_v0 }
 0x3ed   : > { %v1247_v59 = vadd.f32 %v1811_v42, %v1246_v40 }
 0x3ee   : > { %v1221_v32 = vsel %vm1220_vm10, %v1809_v48, %v1217_v3 }
 0x3ef   : > { %v1226_v11 = vsel %vm1223_vm12, %v1225_v47, %v1221_v32  ;;  %v1251_v12 = vsel %vm1250_vm2, %v1811_v42, %v1247_v59 }
 0x3f0   : > { %v1369_v21 = vmul.f32 %v2665_v63, %v1226_v11  ;;  %v1254_v63 = vand.u32 2147483648, %v2705_v31 }
 0x3f1   : > { %v2724_v54 = vpop.eup %1812 }
 0x3f2   : > { %1413 = vmatmul.f32.gmra.mxu2 %v1369_v21  ;;  %1478 = vmatmul.f32.gmra.mxu3 %v1369_v21  ;;  %v1255_v26 = vor.u32 1.1754944e-38, %v1254_v63 }
 0x3f3   : > { %1119 = vadd.xlane.f32.xlu1 %v2724_v54 }
 0x3f4   : > { %v1256_v62 = vsel %vm1253_vm3, %v1255_v26, %v1251_v12 }
 0x3f5   : > { %v1371_v2 = vmul.f32 %v2651_v60, %v1256_v62 }
 0x3fa   : > { %1416 = vmatmul.f32.gmra.mxu2 %v1370_v58  ;;  %1481 = vmatmul.f32.gmra.mxu3 %v1370_v58 }
 0x402   : > { %1419 = vmatmul.f32.gmra.mxu2 %v1371_v2  ;;  %1484 = vmatmul.f32.gmra.mxu3 %v1371_v2 }
 0x414   : > { %v1112_v52 = vpop.xlane.xlu0 %1111 }
 0x415   : > { %1814 = vrcp.f32 %v1112_v52  ;;  %v1284_v46 = vand.u32 2147483648, %v1112_v52  ;;  %vm1278_vm9 = vweird.f32 %v1112_v52  ;;  %v1282_v0 = vand.u32 2147483647, %v1112_v52 }
 0x416   : > { %v1396_v8 = vpop.f32.mrf.mxu2  ;;  %v1461_v33 = vpop.f32.mrf.mxu3 }
 0x417   : > { %1509 = vxpose.xlu0.b32.start [1/16] %v1396_v8, 128  ;;  %v1285_v15 = vor.u32 1.1754944e-38, %v1284_v46  ;;  %vm1283_vm11 = vcmp.eq.f32.partialorder %v1282_v0, 8.507059e+37 }
 0x41b   : > { %v1815_v4 = vpop.eup %1814 }
 0x41c   : > { %v1114_v19 = vpop.xlane.xlu1 %1113  ;;  %v1274_v28 = vmul.f32 %v1815_v4, %v1112_v52  ;;  %vm1279_vm8 = vweird.f32 %v1815_v4 }
 0x41d   : > { %v2736_v16 = vpop.xlane.xlu0 %1117  ;;  %vm1280_vm10 = vmor %vm1278_vm9, %vm1279_vm8  ;;  %v1299_v21 = vand.u32 2147483648, %v1114_v19  ;;  %vm1293_vm13 = vweird.f32 %v1114_v19  ;;  %v1297_v57 = vand.u32 2147483647, %v1114_v19 }
 0x41e   : > { %v1399_v29 = vpop.f32.mrf.mxu2  ;;  %v1464_v41 = vpop.f32.mrf.mxu3  ;;  %v1275_v49 = vsub.f32 1.0, %v1274_v28 }
 0x41f   : > { %1510 = vxpose.xlu0.b32.cont [2/16] %v1399_v29, 128  ;;  %v1300_v27 = vor.u32 1.1754944e-38, %v1299_v21  ;;  %vm1298_vm15 = vcmp.eq.f32.partialorder %v1297_v57, 8.507059e+37 }
 0x420   : > { %v1276_v51 = vmul.f32 %v1815_v4, %v1275_v49 }
 0x422   : > { %v1277_v45 = vadd.f32 %v1815_v4, %v1276_v51 }
 0x424   : > { %v1281_v47 = vsel %vm1280_vm10, %v1815_v4, %v1277_v45 }
 0x425   : > { %v1286_v32 = vsel %vm1283_vm11, %v1285_v15, %v1281_v47 }
 0x426   : > { %v1402_v44 = vpop.f32.mrf.mxu2  ;;  %v1467_v31 = vpop.f32.mrf.mxu3 }
 0x427   : > { %1511 = vxpose.xlu0.b32.cont [3/16] %v1402_v44, 128 }
 0x42d   : > { %1541 = vxpose.xlu1.b32.start [1/16] %v1461_v33, 128 }
 0x42e   : > { %v1405_v30 = vpop.f32.mrf.mxu2  ;;  %v1470_v35 = vpop.f32.mrf.mxu3 }
 0x42f   : > { %1512 = vxpose.xlu0.b32.cont [4/16] %v1405_v30, 128 }
 0x435   : > { %1542 = vxpose.xlu1.b32.cont [2/16] %v1464_v41, 128 }
 0x43d   : > { %1543 = vxpose.xlu1.b32.cont [3/16] %v1467_v31, 128 }
 0x445   : > { %1544 = vxpose.xlu1.b32.cont [4/16] %v1470_v35, 128  ;;  %v1110_v60 = vpop.xlane.xlu2 %1109 }
 0x446   : > { %1816 = vrcp.f32 %v1110_v60  ;;  %v1269_v48 = vand.u32 2147483648, %v1110_v60  ;;  %v1267_v17 = vand.u32 2147483647, %v1110_v60  ;;  %vm1263_vm5 = vweird.f32 %v1110_v60 }
 0x447   : > { %1818 = vrcp.f32 %v1114_v19 }
 0x448   : > { %v1270_v42 = vor.u32 1.1754944e-38, %v1269_v48  ;;  %vm1268_vm7 = vcmp.eq.f32.partialorder %v1267_v17, 8.507059e+37 }
 0x44c   : > { %v1817_v10 = vpop.eup %1816 }
 0x44d   : > { %v1259_v53 = vmul.f32 %v1817_v10, %v1110_v60  ;;  %v2733_v61 = vpop.xlane.xlu2 %1115  ;;  %v1819_v20 = vpop.eup %1818  ;;  %vm1264_vm4 = vweird.f32 %v1817_v10 }
 0x44e   : > { %1820 = vrcp.f32 %v2733_v61  ;;  %v1289_v18 = vmul.f32 %v1819_v20, %v1114_v19  ;;  %vm1265_vm6 = vmor %vm1263_vm5, %vm1264_vm4  ;;  %vm1294_vm12 = vweird.f32 %v1819_v20  ;;  %v1314_v62 = vand.u32 2147483648, %v2733_v61 }
 0x44f   : > { %v1260_v37 = vsub.f32 1.0, %v1259_v53  ;;  %1822 = vrcp.f32 %v2736_v16  ;;  %vm1295_vm14 = vmor %vm1293_vm13, %vm1294_vm12  ;;  %vm1308_vm1 = vweird.f32 %v2733_v61  ;;  %v1312_v8 = vand.u32 2147483647, %v2733_v61 }
 0x450   : > { %v1290_v5 = vsub.f32 1.0, %v1289_v18  ;;  %v1315_v44 = vor.u32 1.1754944e-38, %v1314_v62  ;;  %v1329_v19 = vand.u32 2147483648, %v2736_v16  ;;  %vm1323_vm5 = vweird.f32 %v2736_v16 }
 0x451   : > { %v1261_v39 = vmul.f32 %v1817_v10, %v1260_v37  ;;  %vm1313_vm3 = vcmp.eq.f32.partialorder %v1312_v8, 8.507059e+37 }
 0x452   : > { %v1291_v55 = vmul.f32 %v1819_v20, %v1290_v5 }
 0x453   : > { %v1262_v13 = vadd.f32 %v1817_v10, %v1261_v39 }
 0x454   : > { %v1821_v56 = vpop.eup %1820  ;;  %v1292_v11 = vadd.f32 %v1819_v20, %v1291_v55 }
 0x455   : > { %v1266_v6 = vsel %vm1265_vm6, %v1817_v10, %v1262_v13  ;;  %v1304_v3 = vmul.f32 %v1821_v56, %v2733_v61  ;;  %v2741_v14 = vpop.eup %1822  ;;  %vm1309_vm0 = vweird.f32 %v1821_v56  ;;  %v1327_v10 = vand.u32 2147483647, %v2736_v16 }
 0x456   : > { %v1271_v23 = vsel %vm1268_vm7, %v1270_v42, %v1266_v6  ;;  %v1319_v40 = vmul.f32 %v2741_v14, %v2736_v16  ;;  %v1296_v24 = vsel %vm1295_vm14, %v1819_v20, %v1292_v11  ;;  %v2746_v12 = vpop.xlane.xlu2 %1121  ;;  %vm1310_vm2 = vmor %vm1308_vm1, %vm1309_vm0  ;;  %vm1324_vm4 = vweird.f32 %v2741_v14 }
 0x457   : > { %v1372_v7 = vmul.f32 %v2695_v9, %v1271_v23  ;;  %v1305_v36 = vsub.f32 1.0, %v1304_v3  ;;  %v1373_v9 = vmul.f32 %v2680_v34, %v1286_v32  ;;  %v1301_v58 = vsel %vm1298_vm15, %v1300_v27, %v1296_v24  ;;  %vm1325_vm6 = vmor %vm1323_vm5, %vm1324_vm4 }
 0x458   : > { %v1320_v43 = vsub.f32 1.0, %v1319_v40  ;;  %v1374_v2 = vmul.f32 %v2684_v1, %v1301_v58  ;;  %v1330_v20 = vor.u32 1.1754944e-38, %v1329_v19  ;;  %vm1328_vm7 = vcmp.eq.f32.partialorder %v1327_v10, 8.507059e+37 }
 0x459   : > { %1422 = vmatmul.f32.gmra.mxu2 %v1372_v7  ;;  %1487 = vmatmul.f32.gmra.mxu3 %v1372_v7  ;;  %v1306_v25 = vmul.f32 %v1821_v56, %v1305_v36  ;;  %v1359_v46 = vand.u32 2147483648, %v2746_v12  ;;  %vm1353_vm13 = vweird.f32 %v2746_v12 }
 0x45a   : > { %v1321_v29 = vmul.f32 %v2741_v14, %v1320_v43 }
 0x45b   : > { %v1307_v34 = vadd.f32 %v1821_v56, %v1306_v25  ;;  %v1360_v55 = vor.u32 1.1754944e-38, %v1359_v46 }
 0x45c   : > { %v1322_v1 = vadd.f32 %v2741_v14, %v1321_v29 }
 0x45d   : > { %v1311_v33 = vsel %vm1310_vm2, %v1821_v56, %v1307_v34 }
 0x45e   : > { %v1316_v52 = vsel %vm1313_vm3, %v1315_v44, %v1311_v33  ;;  %v1326_v61 = vsel %vm1325_vm6, %v2741_v14, %v1322_v1 }
 0x45f   : > { %v1375_v28 = vmul.f32 %v2700_v38, %v1316_v52  ;;  %v1331_v39 = vsel %vm1328_vm7, %v1330_v20, %v1326_v61 }
 0x460   : > { %v1376_v18 = vmul.f32 %v2686_v22, %v1331_v39  ;;  %v1357_v22 = vand.u32 2147483647, %v2746_v12 }
 0x461   : > { %1425 = vmatmul.f32.gmra.mxu2 %v1373_v9  ;;  %1490 = vmatmul.f32.gmra.mxu3 %v1373_v9 }
 0x462   : > { %vm1358_vm15 = vcmp.eq.f32.partialorder %v1357_v22, 8.507059e+37 }
 0x465   : > { %v1408_v59 = vpop.f32.mrf.mxu2  ;;  %v1473_v63 = vpop.f32.mrf.mxu3 }
 0x466   : > { %v1120_v26 = vpop.xlane.xlu1 %1119  ;;  %1513 = vxpose.xlu0.b32.cont [5/16] %v1408_v59, 128  ;;  %1545 = vxpose.xlu1.b32.cont [5/16] %v1473_v63, 128 }
 0x467   : > { %1824 = vrcp.f32 %v1120_v26  ;;  %v1344_v38 = vand.u32 2147483648, %v1120_v26  ;;  %vm1338_vm9 = vweird.f32 %v1120_v26  ;;  %v1342_v13 = vand.u32 2147483647, %v1120_v26 }
 0x468   : > { %1826 = vrcp.f32 %v2746_v12 }
 0x469   : > { %1428 = vmatmul.f32.gmra.mxu2 %v1374_v2  ;;  %1493 = vmatmul.f32.gmra.mxu3 %v1374_v2  ;;  %v1345_v16 = vor.u32 1.1754944e-38, %v1344_v38  ;;  %vm1343_vm11 = vcmp.eq.f32.partialorder %v1342_v13, 8.507059e+37 }
 0x46d   : > { %v1825_v30 = vpop.eup %1824  ;;  %v1411_v41 = vpop.f32.mrf.mxu2 }
 0x46e   : > { %v1476_v31 = vpop.f32.mrf.mxu3  ;;  %v1334_v35 = vmul.f32 %v1825_v30, %v1120_v26  ;;  %1514 = vxpose.xlu0.b32.cont [6/16] %v1411_v41, 128  ;;  %v1827_v60 = vpop.eup %1826  ;;  %vm1339_vm8 = vweird.f32 %v1825_v30 }
 0x46f   : > { %1546 = vxpose.xlu1.b32.cont [6/16] %v1476_v31, 128  ;;  %v1349_v53 = vmul.f32 %v1827_v60, %v2746_v12  ;;  %vm1340_vm10 = vmor %vm1338_vm9, %vm1339_vm8  ;;  %vm1354_vm12 = vweird.f32 %v1827_v60 }
 0x470   : > { %v1335_v4 = vsub.f32 1.0, %v1334_v35  ;;  %vm1355_vm14 = vmor %vm1353_vm13, %vm1354_vm12 }
 0x471   : > { %1431 = vmatmul.f32.gmra.mxu2 %v1375_v28  ;;  %1496 = vmatmul.f32.gmra.mxu3 %v1375_v28  ;;  %v1350_v17 = vsub.f32 1.0, %v1349_v53 }
 0x472   : > { %v1336_v49 = vmul.f32 %v1825_v30, %v1335_v4 }
 0x473   : > { %v1351_v42 = vmul.f32 %v1827_v60, %v1350_v17 }
 0x474   : > { %v1337_v51 = vadd.f32 %v1825_v30, %v1336_v49 }
 0x475   : > { %v1414_v37 = vpop.f32.mrf.mxu2  ;;  %v1352_v56 = vadd.f32 %v1827_v60, %v1351_v42 }
 0x476   : > { %v1479_v48 = vpop.f32.mrf.mxu3  ;;  %1515 = vxpose.xlu0.b32.cont [7/16] %v1414_v37, 128  ;;  %v1341_v6 = vsel %vm1340_vm10, %v1825_v30, %v1337_v51 }
 0x477   : > { %1547 = vxpose.xlu1.b32.cont [7/16] %v1479_v48, 128  ;;  %v1346_v45 = vsel %vm1343_vm11, %v1345_v16, %v1341_v6  ;;  %v1356_v0 = vsel %vm1355_vm14, %v1827_v60, %v1352_v56 }
 0x478   : > { %v1377_v7 = vmul.f32 %v2724_v54, %v1346_v45  ;;  %v1361_v15 = vsel %vm1358_vm15, %v1360_v55, %v1356_v0 }
 0x479   : > { %1434 = vmatmul.f32.gmra.mxu2 %v1376_v18  ;;  %1499 = vmatmul.f32.gmra.mxu3 %v1376_v18  ;;  %v1378_v32 = vmul.f32 %v2711_v50, %v1361_v15 }
 0x47d   : > { %v1417_v5 = vpop.f32.mrf.mxu2 }
 0x47e   : > { %v1482_v23 = vpop.f32.mrf.mxu3  ;;  %1516 = vxpose.xlu0.b32.cont [8/16] %v1417_v5, 128 }
 0x47f   : > { %1548 = vxpose.xlu1.b32.cont [8/16] %v1482_v23, 128 }
 0x481   : > { %1437 = vmatmul.f32.gmra.mxu2 %v1377_v7  ;;  %1502 = vmatmul.f32.gmra.mxu3 %v1377_v7 }
 0x485   : > { %v1420_v3 = vpop.f32.mrf.mxu2 }
 0x486   : > { %v1485_v47 = vpop.f32.mrf.mxu3  ;;  %1517 = vxpose.xlu0.b32.cont [9/16] %v1420_v3, 128 }
 0x487   : > { %1549 = vxpose.xlu1.b32.cont [9/16] %v1485_v47, 128 }
 0x489   : > { %1440 = vmatmul.f32.gmra.mxu2 %v1378_v32  ;;  %1505 = vmatmul.f32.gmra.mxu3 %v1378_v32 }
 0x4dc   : > { %v1423_v36 = vpop.f32.mrf.mxu2  ;;  %v1488_v11 = vpop.f32.mrf.mxu3 }
 0x4dd   : > { %1518 = vxpose.xlu0.b32.cont [10/16] %v1423_v36, 128  ;;  %1550 = vxpose.xlu1.b32.cont [10/16] %v1488_v11, 128 }
 0x4e4   : > { %v1426_v54 = vpop.f32.mrf.mxu2  ;;  %v1491_v14 = vpop.f32.mrf.mxu3 }
 0x4e5   : > { %1519 = vxpose.xlu0.b32.cont [11/16] %v1426_v54, 128  ;;  %1551 = vxpose.xlu1.b32.cont [11/16] %v1491_v14, 128 }
 0x4ec   : > { %v1429_v21 = vpop.f32.mrf.mxu2  ;;  %v1494_v9 = vpop.f32.mrf.mxu3 }
 0x4ed   : > { %1552 = vxpose.xlu1.b32.cont [12/16] %v1494_v9, 128  ;;  %1520 = vxpose.xlu0.b32.cont [12/16] %v1429_v21, 128 }
 0x4f4   : > { %v1432_v57 = vpop.f32.mrf.mxu2  ;;  %v1497_v40 = vpop.f32.mrf.mxu3 }
 0x4f5   : > { %1553 = vxpose.xlu1.b32.cont [13/16] %v1497_v40, 128  ;;  %1521 = vxpose.xlu0.b32.cont [13/16] %v1432_v57, 128 }
 0x4fc   : > { %v1435_v50 = vpop.f32.mrf.mxu2  ;;  %v1500_v25 = vpop.f32.mrf.mxu3 }
 0x4fd   : > { %1554 = vxpose.xlu1.b32.cont [14/16] %v1500_v25, 128  ;;  %1522 = vxpose.xlu0.b32.cont [14/16] %v1435_v50, 128 }
 0x504   : > { %v1438_v24 = vpop.f32.mrf.mxu2  ;;  %v1503_v27 = vpop.f32.mrf.mxu3 }
 0x505   : > { %1555 = vxpose.xlu1.b32.cont [15/16] %v1503_v27, 128  ;;  %1523 = vxpose.xlu0.b32.cont [15/16] %v1438_v24, 128 }
 0x50c   : > { %v1441_v59 = vpop.f32.mrf.mxu2  ;;  %v1506_v63 = vpop.f32.mrf.mxu3 }
 0x50d   : > { %1556 = vxpose.xlu1.b32.end [16/16] %v1506_v63, 128  ;;  %1524 = vxpose.xlu0.b32.end [16/16] %v1441_v59, 128 }
 0x539   : > { %v1557_v58 = vpop.trf.xlu1  ;;  %v1525_v43 = vpop.trf.xlu0 }
 0x53a   : > { %1589 = vst [vmem:[%s2770_s7 + $0x80] sm:$0xff] %v1557_v58 }
 0x53b   : > { %1573 = vst [vmem:[%s2770_s7] sm:$0xff] %v1525_v43 }
 0x541   : > { %v1558_v12 = vpop.trf.xlu1  ;;  %v1526_v26 = vpop.trf.xlu0 }
 0x542   : > { %1590 = vst [vmem:[%s2770_s7 + $0x88] sm:$0xff] %v1558_v12 }
 0x543   : > { %1574 = vst [vmem:[%s2770_s7 + $0x8] sm:$0xff] %v1526_v26 }
 0x549   : > { %v1559_v34 = vpop.trf.xlu1  ;;  %v1527_v62 = vpop.trf.xlu0 }
 0x54a   : > { %1591 = vst [vmem:[%s2770_s7 + $0x90] sm:$0xff] %v1559_v34 }
 0x54b   : > { %1575 = vst [vmem:[%s2770_s7 + $0x10] sm:$0xff] %v1527_v62 }
 0x551   : > { %v1560_v2 = vpop.trf.xlu1  ;;  %v1528_v8 = vpop.trf.xlu0 }
 0x552   : > { %1592 = vst [vmem:[%s2770_s7 + $0x98] sm:$0xff] %v1560_v2 }
 0x553   : > { %1576 = vst [vmem:[%s2770_s7 + $0x18] sm:$0xff] %v1528_v8 }
 0x559   : > { %v1561_v29 = vpop.trf.xlu1  ;;  %v1529_v33 = vpop.trf.xlu0 }
 0x55a   : > { %1593 = vst [vmem:[%s2770_s7 + $0xa0] sm:$0xff] %v1561_v29 }
 0x55b   : > { %1577 = vst [vmem:[%s2770_s7 + $0x20] sm:$0xff] %v1529_v33 }
 0x561   : > { %v1562_v44 = vpop.trf.xlu1  ;;  %v1530_v30 = vpop.trf.xlu0 }
 0x562   : > { %1594 = vst [vmem:[%s2770_s7 + $0xa8] sm:$0xff] %v1562_v44 }
 0x563   : > { %1578 = vst [vmem:[%s2770_s7 + $0x28] sm:$0xff] %v1530_v30 }
 0x569   : > { %v1563_v41 = vpop.trf.xlu1  ;;  %v1531_v31 = vpop.trf.xlu0 }
 0x56a   : > { %1595 = vst [vmem:[%s2770_s7 + $0xb0] sm:$0xff] %v1563_v41 }
 0x56b   : > { %1579 = vst [vmem:[%s2770_s7 + $0x30] sm:$0xff] %v1531_v31 }
 0x571   : > { %v1564_v52 = vpop.trf.xlu1  ;;  %v1532_v35 = vpop.trf.xlu0 }
 0x572   : > { %1596 = vst [vmem:[%s2770_s7 + $0xb8] sm:$0xff] %v1564_v52 }
 0x573   : > { %1580 = vst [vmem:[%s2770_s7 + $0x38] sm:$0xff] %v1532_v35 }
 0x579   : > { %v1565_v1 = vpop.trf.xlu1  ;;  %v1533_v60 = vpop.trf.xlu0 }
 0x57a   : > { %1597 = vst [vmem:[%s2770_s7 + $0xc0] sm:$0xff] %v1565_v1 }
 0x57b   : > { %1581 = vst [vmem:[%s2770_s7 + $0x40] sm:$0xff] %v1533_v60 }
 0x581   : > { %v1566_v19 = vpop.trf.xlu1  ;;  %v1534_v4 = vpop.trf.xlu0 }
 0x582   : > { %1598 = vst [vmem:[%s2770_s7 + $0xc8] sm:$0xff] %v1566_v19 }
 0x583   : > { %1582 = vst [vmem:[%s2770_s7 + $0x48] sm:$0xff] %v1534_v4 }
 0x589   : > { %v1567_v28 = vpop.trf.xlu1  ;;  %v1535_v10 = vpop.trf.xlu0 }
 0x58a   : > { %1599 = vst [vmem:[%s2770_s7 + $0xd0] sm:$0xff] %v1567_v28 }
 0x58b   : > { %1583 = vst [vmem:[%s2770_s7 + $0x50] sm:$0xff] %v1535_v10 }
 0x591   : > { %v1568_v53 = vpop.trf.xlu1  ;;  %v1536_v49 = vpop.trf.xlu0 }
 0x592   : > { %1600 = vst [vmem:[%s2770_s7 + $0xd8] sm:$0xff] %v1568_v53 }
 0x593   : > { %1584 = vst [vmem:[%s2770_s7 + $0x58] sm:$0xff] %v1536_v49 }
 0x599   : > { %v1569_v61 = vpop.trf.xlu1  ;;  %v1537_v20 = vpop.trf.xlu0 }
 0x59a   : > { %1601 = vst [vmem:[%s2770_s7 + $0xe0] sm:$0xff] %v1569_v61 }
 0x59b   : > { %1585 = vst [vmem:[%s2770_s7 + $0x60] sm:$0xff] %v1537_v20 }
 0x5a1   : > { %v1570_v37 = vpop.trf.xlu1  ;;  %v1538_v48 = vpop.trf.xlu0 }
 0x5a2   : > { %1602 = vst [vmem:[%s2770_s7 + $0xe8] sm:$0xff] %v1570_v37 }
 0x5a3   : > { %1586 = vst [vmem:[%s2770_s7 + $0x68] sm:$0xff] %v1538_v48 }
 0x5a9   : > { %v1571_v39 = vpop.trf.xlu1  ;;  %v1539_v17 = vpop.trf.xlu0 }
 0x5aa   : > { %1603 = vst [vmem:[%s2770_s7 + $0xf0] sm:$0xff] %v1571_v39 }
 0x5ab   : > { %1587 = vst [vmem:[%s2770_s7 + $0x70] sm:$0xff] %v1539_v17 }
 0x5b1   : > { %v1572_v51 = vpop.trf.xlu1  ;;  %v1540_v38 = vpop.trf.xlu0 }
 0x5b2   : > { %1604 = vst [vmem:[%s2770_s7 + $0xf8] sm:$0xff] %v1572_v51 }
 0x5b3   : > { %1588 = vst [vmem:[%s2770_s7 + $0x78] sm:$0xff] %v1540_v38 }
 0x5b4   : > { %1885 = shalt.err (!%p1882_p4)
}
 0x5b5   : > { %s1929_s29 = smov 128   ;;  %s1930_s28 = smov 8  }
 0x5b6   : > { %1712 = dma.vmem_to_hbm [thread:$0]  (%p2001_p11), %s1619_s10, 4096, %s1621_s11, %s1606_s17, %s1929_s29, %s1929_s29, %s1930_s28  }
 0x5b7 PF: > { %s1635_s4 = sand.u32 1, %s1912_s12   ;;  %p2875_p7 = scmp.ge.s32.totalorder %s1924_s15, 2 }
 0x5b8   : > { %s1636_s5 = scalar_lea.sflag [#allocation4], %s1635_s4 }
 0x5b9   : > { %p1719_p5 = pnand %p2875_p7, %p2005_p12 }
 0x5bb   : > { %p1720_p8 = pneg %p1719_p5 }
 0x5bd   : > { %1907 = dma.done.wait (%p1720_p8), %s1636_s5, 4096  }
 0x5be   : > { %1909 = vsyncadd (%p1720_p8), %s1636_s5, 4294963200  ;;  %p16_p10 = scmp.ge.s32.totalorder %s1976_s18, 4   ;;  %s2876_s12 = smov %s1916_s13 }
 0x5bf   : > { %s2877_s13 = smov %s1920_s14  ;;  %s2878_s14 = smov %s1988_s21 }
 0x5c0   : > { %s2879_s15 = smov %s1976_s18  ;;  %18 = sbr.rel (!%p16_p10) target bundleno = 5 (0x5), region = 77 }
 0x5c5   :  { %1642 = vsyncpa [#allocation3], 1 }
 0x5c6   :  { %1644 = vsyncpa [#allocation3 + $0x1], 1 }
 0x5c7   :  { %1645 = vsyncpa [#allocation4], 1 }
 0x5c8   :  { %1647 = vsyncpa [#allocation4 + $0x1], 1 }

</bundles_post_ra>
